<compile_context>
chip_gen: v7x
topology: tpu7x:2x2x1
jax: 0.10.0
libtpu: 0.0.40
codegen_flags: <defaults>
</compile_context>

<pallas_src>
import functools
import math

import jax
import jax.numpy as jnp
import numpy as np
from jax.experimental import pallas as pl
from jax.experimental.pallas import tpu as pltpu

LN_EPS = 1e-12  # espnet LayerNorm uses eps=1e-12


def _layer_norm(x, g, b):
    mu = jnp.mean(x, axis=-1, keepdims=True)
    var = jnp.mean(jnp.square(x - mu), axis=-1, keepdims=True)
    return (x - mu) * jax.lax.rsqrt(var + LN_EPS) * g + b


# ----------------------------------------------------------------------------
# Fused Pallas kernel: all decoder layers + cache concat + output head.
#   grid = (B, L);  b is "parallel", l is "arbitrary" (sequential carry).
# ----------------------------------------------------------------------------
_N_FIXED = 18  # number of non-cache inputs


def _fused_decode_kernel(*refs, num_heads, num_layers):
    (x0_ref, mem_ref, hdh_ref, hhd_ref,
     lng_ref, lnb_ref, saw_ref, sab_ref, caw_ref, cab_ref,
     w1_ref, b1_ref, w2_ref, b2_ref,
     ang_ref, anb_ref, outw_ref, outb_ref) = refs[:_N_FIXED]
    cache_refs = refs[_N_FIXED:_N_FIXED + num_layers]
    y_ref = refs[_N_FIXED + num_layers]
    nc_refs = refs[_N_FIXED + num_layers + 1:_N_FIXED + 2 * num_layers + 1]
    x_scr = refs[_N_FIXED + 2 * num_layers + 1]

    l = pl.program_id(1)

    # Layer 0: seed the carried decoder state with the embedded input.
    @pl.when(l == 0)
    def _():
        x_scr[...] = x0_ref[...]

    x = x_scr[...]                      # (T, D)  f32 carried state
    mem = mem_ref[...]                  # (Tm, D) f32 encoder memory
    T, D = x.shape
    Tc = cache_refs[0].shape[0]
    dk = D // num_heads
    scale = 1.0 / math.sqrt(dk)

    cdt = saw_ref.dtype                 # matmul compute dtype (bf16 or f32)
    use_approx = cdt != jnp.float32     # EUP reciprocal only in low-precision mode

    hdh = hdh_ref[...]                  # (D, H) one-hot: feature -> head
    hhd = hhd_ref[...]                  # (H, D) one-hot: head   -> feature
    lng = lng_ref[...]                  # (3, D)
    lnb = lnb_ref[...]
    saw = saw_ref[...]                  # (4, D, D)  Wq,Wk,Wv,Wo
    sab = sab_ref[...]                  # (4, D)
    caw = caw_ref[...]
    cab = cab_ref[...]

    def mha(q_in, kv, W, Bias):
        # q_in: (1, D) single query, kv: (Tk, D).
        q = jnp.dot(q_in.astype(cdt), W[0], preferred_element_type=jnp.float32) + Bias[0:1, :]
        k = jnp.dot(kv.astype(cdt), W[1], preferred_element_type=jnp.float32) + Bias[1:2, :]
        v = jnp.dot(kv.astype(cdt), W[2], preferred_element_type=jnp.float32) + Bias[2:3, :]
        # scores[t, h] = sum_{d in head h} q[d] * k[t, d]
        # NOTE: no mask add -- the last row of (1 - tril) * -1e4 is identically 0.
        scores = jnp.dot((k * q).astype(cdt), hdh,
                         preferred_element_type=jnp.float32) * scale      # (Tk, H)
        m = jnp.max(scores, axis=0, keepdims=True)
        e = jnp.exp(scores - m)
        denom = jnp.sum(e, axis=0, keepdims=True)
        if use_approx:
            p = e * pl.reciprocal(denom, approx=True)
        else:
            p = e / denom                                                  # softmax over keys
        pv = jnp.dot(p.astype(cdt), hhd, preferred_element_type=jnp.float32)  # (Tk, D)
        ctx = jnp.sum(pv * v, axis=0, keepdims=True)                       # (1, D)
        return jnp.dot(ctx.astype(cdt), W[3], preferred_element_type=jnp.float32) + Bias[3:4, :]

    # --- masked self-attention (cache mode: query = last position only) ---
    x_ln = _layer_norm(x, lng[0:1, :], lnb[0:1, :])          # norm1 over full (T, D)
    residual = x[T - 1:T, :]                                 # (1, D)
    x1 = residual + mha(x_ln[T - 1:T, :], x_ln, saw, sab)

    # --- source attention over encoder memory (memory_mask is None) ---
    x2 = x1 + mha(_layer_norm(x1, lng[1:2, :], lnb[1:2, :]), mem, caw, cab)

    # --- position-wise feed-forward ---
    x3_ln = _layer_norm(x2, lng[2:3, :], lnb[2:3, :])
    h = jnp.maximum(
        jnp.dot(x3_ln.astype(cdt), w1_ref[...], preferred_element_type=jnp.float32)
        + b1_ref[...], 0.0)
    x_new = x2 + jnp.dot(h.astype(cdt), w2_ref[...],
                         preferred_element_type=jnp.float32) + b2_ref[...]   # (1, D)

    # In-kernel cache update and state carry:
    #   new_cache_l = cat([cache_l, x_new], time);  x_next = new_cache_l[1:, :].
    for i in range(num_layers):
        @pl.when(l == i)
        def _(i=i):
            c = cache_refs[i][...]                    # (Tc, D)
            nc_refs[i][0:Tc, :] = c
            nc_refs[i][Tc:Tc + 1, :] = x_new
            x_scr[0:T - 1, :] = c[1:Tc, :]            # requires Tc == T (asserted)
            x_scr[T - 1:T, :] = x_new

    # --- final iteration: after_norm + output_layer + log_softmax ---
    @pl.when(l == num_layers - 1)
    def _():
        y_in = _layer_norm(x_new, ang_ref[...], anb_ref[...])                 # (1, D)
        logits = jnp.dot(y_in.astype(cdt), outw_ref[...],
                         preferred_element_type=jnp.float32) + outb_ref[...]  # (1, V)
        mx = jnp.max(logits, axis=-1, keepdims=True)
        lse = mx + jnp.log(jnp.sum(jnp.exp(logits - mx), axis=-1, keepdims=True))
        y_ref[...] = logits - lse                                             # log_softmax


def _build_step_call(*, B, T, Tm, D, FF, V, L, H):
    kernel = functools.partial(_fused_decode_kernel, num_heads=H, num_layers=L)
    cache_specs = [pl.BlockSpec((None, T, D), lambda b, l: (b, 0, 0)) for _ in range(L)]
    nc_specs = [pl.BlockSpec((None, T + 1, D), lambda b, l: (b, 0, 0)) for _ in range(L)]
    in_specs = [
        pl.BlockSpec((None, T, D), lambda b, l: (b, 0, 0)),          # x0 (embedded tgt)
        pl.BlockSpec((None, Tm, D), lambda b, l: (b, 0, 0)),         # encoder memory
        pl.BlockSpec((D, H), lambda b, l: (0, 0)),                   # head one-hot (D,H)
        pl.BlockSpec((H, D), lambda b, l: (0, 0)),                   # head one-hot (H,D)
        pl.BlockSpec((None, 3, D), lambda b, l: (l, 0, 0)),          # LN gammas  [L,3,D]
        pl.BlockSpec((None, 3, D), lambda b, l: (l, 0, 0)),          # LN betas   [L,3,D]
        pl.BlockSpec((None, 4, D, D), lambda b, l: (l, 0, 0, 0)),    # self-attn W
        pl.BlockSpec((None, 4, D), lambda b, l: (l, 0, 0)),          # self-attn b
        pl.BlockSpec((None, 4, D, D), lambda b, l: (l, 0, 0, 0)),    # src-attn  W
        pl.BlockSpec((None, 4, D), lambda b, l: (l, 0, 0)),          # src-attn  b
        pl.BlockSpec((None, D, FF), lambda b, l: (l, 0, 0)),         # FFN W1
        pl.BlockSpec((None, 1, FF), lambda b, l: (l, 0, 0)),         # FFN b1
        pl.BlockSpec((None, FF, D), lambda b, l: (l, 0, 0)),         # FFN W2
        pl.BlockSpec((None, 1, D), lambda b, l: (l, 0, 0)),          # FFN b2
        pl.BlockSpec((1, D), lambda b, l: (0, 0)),                   # after_norm gamma
        pl.BlockSpec((1, D), lambda b, l: (0, 0)),                   # after_norm beta
        pl.BlockSpec((D, V), lambda b, l: (0, 0)),                   # output W
        pl.BlockSpec((1, V), lambda b, l: (0, 0)),                   # output b
    ] + cache_specs
    out_shape = tuple([jax.ShapeDtypeStruct((B, 1, V), jnp.float32)]
                      + [jax.ShapeDtypeStruct((B, T + 1, D), jnp.float32)] * L)
    out_specs = tuple([pl.BlockSpec((None, 1, V), lambda b, l: (b, 0, 0))] + nc_specs)
    return pl.pallas_call(
        kernel,
        grid=(B, L),
        in_specs=in_specs,
        out_specs=out_specs,
        out_shape=out_shape,
        scratch_shapes=[pltpu.VMEM((T, D), jnp.float32)],   # carried decoder state
        compiler_params=pltpu.CompilerParams(
            dimension_semantics=("parallel", "arbitrary")),
    )


# ----------------------------------------------------------------------------
# Parameter preparation (done once, outside the decode loop)
# ----------------------------------------------------------------------------
def _head_onehots(D, H, dtype):
    dk = D // H
    head_dh = (np.arange(D)[:, None] // dk == np.arange(H)[None, :]).astype(np.float32)
    return jnp.asarray(head_dh, dtype), jnp.asarray(head_dh.T, dtype)


def sinusoidal_pe(max_len, d_model):
    pos = np.arange(max_len, dtype=np.float32)[:, None]
    div = np.exp(np.arange(0, d_model, 2, dtype=np.float32)
                 * (-math.log(10000.0) / d_model))
    pe = np.zeros((max_len, d_model), dtype=np.float32)
    pe[:, 0::2] = np.sin(pos * div)
    pe[:, 1::2] = np.cos(pos * div)
    return jnp.asarray(pe)


def prepare_params(params, matmul_dtype=jnp.bfloat16):
    """Stack per-layer weights to [L, ...] and cast matmul weights to matmul_dtype."""
    stack = lambda key: jnp.stack([lyr[key] for lyr in params["layers"]])
    D = params["emb"].shape[1]
    H = params["num_heads"]
    head_dh, head_hd = _head_onehots(D, H, matmul_dtype)
    return dict(
        emb=params["emb"], pe=params["pe"],
        head_dh=head_dh, head_hd=head_hd,
        ln_g=stack("ln_g"), ln_b=stack("ln_b"),
        sa_w=stack("sa_w").astype(matmul_dtype), sa_b=stack("sa_b"),
        ca_w=stack("ca_w").astype(matmul_dtype), ca_b=stack("ca_b"),
        w1=stack("w1").astype(matmul_dtype), b1=stack("b1"),
        w2=stack("w2").astype(matmul_dtype), b2=stack("b2"),
        an_g=params["an_g"], an_b=params["an_b"],
        out_w=params["out_w"].astype(matmul_dtype), out_b=params["out_b"],
    )


def xformer_decoder_forward(tgt, memory, cache, prep, *, num_heads):
    B, T = tgt.shape
    D = prep["emb"].shape[1]
    L = prep["sa_w"].shape[0]
    Tm = memory.shape[1]
    FF = prep["w1"].shape[2]
    V = prep["out_w"].shape[1]
    assert cache[0].shape[1] == T, (
        "fused decode kernel assumes cache length == tgt length (as in the export path)")
    # Embedding gather + scale + sinusoidal PE stays in XLA (trivial gather).
    x0 = prep["emb"][tgt] * math.sqrt(D) + prep["pe"][None, :T, :]
    step = _build_step_call(B=B, T=T, Tm=Tm, D=D, FF=FF, V=V, L=L, H=num_heads)
    outs = step(x0, memory, prep["head_dh"], prep["head_hd"],
                prep["ln_g"], prep["ln_b"], prep["sa_w"], prep["sa_b"],
                prep["ca_w"], prep["ca_b"], prep["w1"], prep["b1"],
                prep["w2"], prep["b2"], prep["an_g"], prep["an_b"],
                prep["out_w"], prep["out_b"], *cache)
    y = outs[0][:, 0, :]                # (B, V) log-probs
    new_cache = list(outs[1:])          # list of (B, T+1, D)
    return y, new_cache


# ----------------------------------------------------------------------------
# Pure-JAX reference (mirrors the PyTorch forward), used for correctness check
# ----------------------------------------------------------------------------
def embed_ref(tgt, emb_table, pe, d_model):
    return emb_table[tgt] * math.sqrt(d_model) + pe[None, : tgt.shape[1], :]


def ref_mha(q, kv, W, Bias, mask, H):
    B, _, D = q.shape
    dk = D // H
    qh = (q @ W[0] + Bias[0]).reshape(B, -1, H, dk).transpose(0, 2, 1, 3)
    kh = (kv @ W[1] + Bias[1]).reshape(B, -1, H, dk).transpose(0, 2, 1, 3)
    vh = (kv @ W[2] + Bias[2]).reshape(B, -1, H, dk).transpose(0, 2, 1, 3)
    scores = jnp.einsum("bhqd,bhkd->bhqk", qh, kh) / math.sqrt(dk)
    if mask is not None:
        scores = scores + mask
    p = jax.nn.softmax(scores, axis=-1)
    ctx = jnp.einsum("bhqk,bhkd->bhqd", p, vh).transpose(0, 2, 1, 3).reshape(B, -1, D)
    return ctx @ W[3] + Bias[3]


def ref_layer(x, memory, mask4, p, H):
    ln = lambda z, i: _layer_norm(z, p["ln_g"][i], p["ln_b"][i])
    x_ln = ln(x, 0)
    residual = x[:, -1:, :]
    x1 = residual + ref_mha(x_ln[:, -1:, :], x_ln, p["sa_w"], p["sa_b"],
                            mask4[:, :, -1:, :], H)
    x2 = x1 + ref_mha(ln(x1, 1), memory, p["ca_w"], p["ca_b"], None, H)
    h = jnp.maximum(ln(x2, 2) @ p["w1"] + p["b1"], 0.0)
    return x2 + h @ p["w2"] + p["b2"]


def ref_forward(tgt, memory, cache, params):
    B, T = tgt.shape
    D = params["emb"].shape[1]
    H = params["num_heads"]
    x = embed_ref(tgt, params["emb"], params["pe"], D)
    tri = jnp.tril(jnp.ones((T, T), jnp.float32))
    mask4 = ((1.0 - tri) * -10000.0)[None, None]
    new_cache = []
    for p, c in zip(params["layers"], cache):
        x_new = ref_layer(x, memory, mask4, p, H)
        nc = jnp.concatenate([c, x_new], axis=1)
        new_cache.append(nc)
        x = nc[:, 1:, :]
    y = _layer_norm(x[:, -1, :], params["an_g"], params["an_b"])
    logits = y @ params["out_w"] + params["out_b"]
    return jax.nn.log_softmax(logits, axis=-1), new_cache


# ----------------------------------------------------------------------------
if __name__ == "__main__":
    B, T, Tm = 2, 8, 12
    D, H, FF, V = 32, 4, 64, 50
    n_layers = 2
    max_seq_len = 64

    key = jax.random.PRNGKey(0)
    keys = jax.random.split(key, 8 + 10 * n_layers)
    ki = iter(keys)

    def nrm(shape, scale=0.1):
        return (scale * jax.random.normal(next(ki), shape)).astype(jnp.float32)

    layers = []
    for _ in range(n_layers):
        layers.append(dict(
            ln_g=1.0 + nrm((3, D), 0.05), ln_b=nrm((3, D), 0.05),
            sa_w=nrm((4, D, D)), sa_b=nrm((4, D), 0.02),
            ca_w=nrm((4, D, D)), ca_b=nrm((4, D), 0.02),
            w1=nrm((D, FF)), b1=nrm((1, FF), 0.02),
            w2=nrm((FF, D)), b2=nrm((1, D), 0.02),
        ))
    params = dict(
        emb=nrm((V, D), 1.0),
        pe=sinusoidal_pe(max_seq_len, D),
        layers=layers,
        num_heads=H,
        an_g=1.0 + nrm((1, D), 0.05), an_b=nrm((1, D), 0.05),
        out_w=nrm((D, V)), out_b=nrm((1, V), 0.02),
    )

    tgt = jax.random.randint(next(ki), (B, T), 0, V)
    memory = nrm((B, Tm, D), 1.0)
    cache = [jnp.zeros((B, T, D), jnp.float32) for _ in range(n_layers)]

    fwd = jax.jit(functools.partial(xformer_decoder_forward, num_heads=H))
    y_ref, cache_ref = ref_forward(tgt, memory, cache, params)

    # 1) exactness check: fused kernel with f32 MXU dots.
    prep_f32 = prepare_params(params, jnp.float32)
    y32, nc32 = fwd(tgt, memory, cache, prep_f32)
    jax.block_until_ready((y32, nc32))
    np.testing.assert_allclose(np.asarray(y32), np.asarray(y_ref), rtol=1e-3, atol=1e-3)
    for a, b in zip(nc32, cache_ref):
        np.testing.assert_allclose(np.asarray(a), np.asarray(b), rtol=1e-3, atol=1e-3)

    # 2) performance mode: bf16 MXU dots (f32 accumulate, f32 LN/softmax).
    prep_bf16 = prepare_params(params, jnp.bfloat16)
    y16, nc16 = fwd(tgt, memory, cache, prep_bf16)
    jax.block_until_ready((y16, nc16))
    np.testing.assert_allclose(np.asarray(y16), np.asarray(y_ref), rtol=0.1, atol=0.25)
    for a, b in zip(nc16, cache_ref):
        np.testing.assert_allclose(np.asarray(a), np.asarray(b), rtol=0.1, atol=0.25)

    print("KERNEL_OK")
</pallas_src>

<mosaic_0001>
module attributes {stable_mosaic.version = 11 : i64} {
  func.func @_fused_decode_kernel(%arg0: i32, %arg1: i32, %arg2: memref<1x8x32xf32, #tpu.memory_space<vmem>>, %arg3: memref<1x12x32xf32, #tpu.memory_space<vmem>>, %arg4: memref<32x4xf32, #tpu.memory_space<vmem>>, %arg5: memref<4x32xf32, #tpu.memory_space<vmem>>, %arg6: memref<1x3x32xf32, #tpu.memory_space<vmem>>, %arg7: memref<1x3x32xf32, #tpu.memory_space<vmem>>, %arg8: memref<1x4x32x32xf32, #tpu.memory_space<vmem>>, %arg9: memref<1x4x32xf32, #tpu.memory_space<vmem>>, %arg10: memref<1x4x32x32xf32, #tpu.memory_space<vmem>>, %arg11: memref<1x4x32xf32, #tpu.memory_space<vmem>>, %arg12: memref<1x32x64xf32, #tpu.memory_space<vmem>>, %arg13: memref<1x1x64xf32, #tpu.memory_space<vmem>>, %arg14: memref<1x64x32xf32, #tpu.memory_space<vmem>>, %arg15: memref<1x1x32xf32, #tpu.memory_space<vmem>>, %arg16: memref<1x32xf32, #tpu.memory_space<vmem>>, %arg17: memref<1x32xf32, #tpu.memory_space<vmem>>, %arg18: memref<32x50xf32, #tpu.memory_space<vmem>>, %arg19: memref<1x50xf32, #tpu.memory_space<vmem>>, %arg20: memref<1x8x32xf32, #tpu.memory_space<vmem>>, %arg21: memref<1x8x32xf32, #tpu.memory_space<vmem>>, %arg22: memref<1x1x50xf32, #tpu.memory_space<vmem>>, %arg23: memref<1x9x32xf32, #tpu.memory_space<vmem>>, %arg24: memref<1x9x32xf32, #tpu.memory_space<vmem>>, %arg25: memref<8x32xf32, #tpu.memory_space<vmem>>) attributes {dimension_semantics = [#tpu.dimension_semantics<parallel>, #tpu.dimension_semantics<arbitrary>], iteration_bounds = array<i64: 2, 2>, scalar_prefetch = 0 : i64, scratch_operands = 1 : i64, tpu.core_type = #tpu.core_type<tc>, window_params = [{transform_indices = @transform_0, window_bounds = array<i64: 1, 8, 32>}, {transform_indices = @transform_1, window_bounds = array<i64: 1, 12, 32>}, {pipeline_mode = #tpu.pipeline_mode<synchronous>, transform_indices = @transform_2, window_bounds = array<i64: 32, 4>}, {pipeline_mode = #tpu.pipeline_mode<synchronous>, transform_indices = @transform_3, window_bounds = array<i64: 4, 32>}, {transform_indices = @transform_4, window_bounds = array<i64: 1, 3, 32>}, {transform_indices = @transform_5, window_bounds = array<i64: 1, 3, 32>}, {transform_indices = @transform_6, window_bounds = array<i64: 1, 4, 32, 32>}, {transform_indices = @transform_7, window_bounds = array<i64: 1, 4, 32>}, {transform_indices = @transform_8, window_bounds = array<i64: 1, 4, 32, 32>}, {transform_indices = @transform_9, window_bounds = array<i64: 1, 4, 32>}, {transform_indices = @transform_10, window_bounds = array<i64: 1, 32, 64>}, {transform_indices = @transform_11, window_bounds = array<i64: 1, 1, 64>}, {transform_indices = @transform_12, window_bounds = array<i64: 1, 64, 32>}, {transform_indices = @transform_13, window_bounds = array<i64: 1, 1, 32>}, {pipeline_mode = #tpu.pipeline_mode<synchronous>, transform_indices = @transform_14, window_bounds = array<i64: 1, 32>}, {pipeline_mode = #tpu.pipeline_mode<synchronous>, transform_indices = @transform_15, window_bounds = array<i64: 1, 32>}, {pipeline_mode = #tpu.pipeline_mode<synchronous>, transform_indices = @transform_16, window_bounds = array<i64: 32, 50>}, {pipeline_mode = #tpu.pipeline_mode<synchronous>, transform_indices = @transform_17, window_bounds = array<i64: 1, 50>}, {transform_indices = @transform_18, window_bounds = array<i64: 1, 8, 32>}, {transform_indices = @transform_19, window_bounds = array<i64: 1, 8, 32>}, {transform_indices = @transform_20, window_bounds = array<i64: 1, 1, 50>}, {transform_indices = @transform_21, window_bounds = array<i64: 1, 9, 32>}, {transform_indices = @transform_22, window_bounds = array<i64: 1, 9, 32>}]} {
    %c0_i32 = arith.constant 0 : i32
    %0 = arith.cmpi eq, %arg1, %c0_i32 : i32
    %1 = arith.extui %0 : i1 to i32
    %c0_i32_0 = arith.constant 0 : i32
    %2 = arith.cmpi ne, %1, %c0_i32_0 : i32
    scf.if %2 {
      %c0_83 = arith.constant 0 : index
      %c0_84 = arith.constant 0 : index
      %c0_85 = arith.constant 0 : index
      %196 = vector.load %arg2[%c0_83, %c0_84, %c0_85] : memref<1x8x32xf32, #tpu.memory_space<vmem>>, vector<1x8x32xf32>
      %197 = vector.shape_cast %196 : vector<1x8x32xf32> to vector<8x32xf32>
      %c0_86 = arith.constant 0 : index
      %c0_87 = arith.constant 0 : index
      %198 = vector.load %arg25[%c0_86, %c0_87] : memref<8x32xf32, #tpu.memory_space<vmem>>, vector<8x32xf32>
      tpu.vector_store %arg25[%c0_86, %c0_87], %197 {strides = array<i32>} : memref<8x32xf32, #tpu.memory_space<vmem>>, vector<8x32xf32>,
    } else {
    }
    %c0 = arith.constant 0 : index
    %c0_1 = arith.constant 0 : index
    %3 = vector.load %arg25[%c0, %c0_1] : memref<8x32xf32, #tpu.memory_space<vmem>>, vector<8x32xf32>
    %c0_2 = arith.constant 0 : index
    %c0_3 = arith.constant 0 : index
    %c0_4 = arith.constant 0 : index
    %4 = vector.load %arg3[%c0_2, %c0_3, %c0_4] : memref<1x12x32xf32, #tpu.memory_space<vmem>>, vector<1x12x32xf32>
    %5 = vector.shape_cast %4 : vector<1x12x32xf32> to vector<12x32xf32>
    %c0_5 = arith.constant 0 : index
    %c0_6 = arith.constant 0 : index
    %6 = vector.load %arg4[%c0_5, %c0_6] : memref<32x4xf32, #tpu.memory_space<vmem>>, vector<32x4xf32>
    %c0_7 = arith.constant 0 : index
    %c0_8 = arith.constant 0 : index
    %7 = vector.load %arg5[%c0_7, %c0_8] : memref<4x32xf32, #tpu.memory_space<vmem>>, vector<4x32xf32>
    %c0_9 = arith.constant 0 : index
    %c0_10 = arith.constant 0 : index
    %c0_11 = arith.constant 0 : index
    %8 = vector.load %arg6[%c0_9, %c0_10, %c0_11] : memref<1x3x32xf32, #tpu.memory_space<vmem>>, vector<1x3x32xf32>
    %9 = vector.shape_cast %8 : vector<1x3x32xf32> to vector<3x32xf32>
    %c0_12 = arith.constant 0 : index
    %c0_13 = arith.constant 0 : index
    %c0_14 = arith.constant 0 : index
    %10 = vector.load %arg7[%c0_12, %c0_13, %c0_14] : memref<1x3x32xf32, #tpu.memory_space<vmem>>, vector<1x3x32xf32>
    %11 = vector.shape_cast %10 : vector<1x3x32xf32> to vector<3x32xf32>
    %c0_15 = arith.constant 0 : index
    %c0_16 = arith.constant 0 : index
    %c0_17 = arith.constant 0 : index
    %c0_18 = arith.constant 0 : index
    %12 = vector.load %arg8[%c0_15, %c0_16, %c0_17, %c0_18] : memref<1x4x32x32xf32, #tpu.memory_space<vmem>>, vector<1x4x32x32xf32>
    %13 = vector.shape_cast %12 : vector<1x4x32x32xf32> to vector<4x32x32xf32>
    %c0_19 = arith.constant 0 : index
    %c0_20 = arith.constant 0 : index
    %c0_21 = arith.constant 0 : index
    %14 = vector.load %arg9[%c0_19, %c0_20, %c0_21] : memref<1x4x32xf32, #tpu.memory_space<vmem>>, vector<1x4x32xf32>
    %15 = vector.shape_cast %14 : vector<1x4x32xf32> to vector<4x32xf32>
    %c0_22 = arith.constant 0 : index
    %c0_23 = arith.constant 0 : index
    %c0_24 = arith.constant 0 : index
    %c0_25 = arith.constant 0 : index
    %16 = vector.load %arg10[%c0_22, %c0_23, %c0_24, %c0_25] : memref<1x4x32x32xf32, #tpu.memory_space<vmem>>, vector<1x4x32x32xf32>
    %17 = vector.shape_cast %16 : vector<1x4x32x32xf32> to vector<4x32x32xf32>
    %c0_26 = arith.constant 0 : index
    %c0_27 = arith.constant 0 : index
    %c0_28 = arith.constant 0 : index
    %18 = vector.load %arg11[%c0_26, %c0_27, %c0_28] : memref<1x4x32xf32, #tpu.memory_space<vmem>>, vector<1x4x32xf32>
    %19 = vector.shape_cast %18 : vector<1x4x32xf32> to vector<4x32xf32>
    %20 = vector.extract_strided_slice %9 {offsets = [0, 0], sizes = [1, 32], strides = [1, 1]} : vector<3x32xf32> to vector<1x32xf32>
    %21 = vector.extract_strided_slice %11 {offsets = [0, 0], sizes = [1, 32], strides = [1, 1]} : vector<3x32xf32> to vector<1x32xf32>
    %cst = arith.constant dense<0.000000e+00> : vector<8xf32>
    %22 = vector.multi_reduction <add>, %3, %cst [1] : vector<8x32xf32> to vector<8xf32>
    %23 = vector.shape_cast %22 : vector<8xf32> to vector<8x1xf32>
    %cst_29 = arith.constant 3.200000e+01 : f32
    %24 = vector.broadcast %cst_29 : f32 to vector<8x1xf32>
    %25 = arith.divf %23, %24 : vector<8x1xf32>
    %26 = vector.broadcast %25 : vector<8x1xf32> to vector<8x32xf32>
    %27 = arith.subf %3, %26 : vector<8x32xf32>
    %28 = arith.mulf %27, %27 : vector<8x32xf32>
    %cst_30 = arith.constant dense<0.000000e+00> : vector<8xf32>
    %29 = vector.multi_reduction <add>, %28, %cst_30 [1] : vector<8x32xf32> to vector<8xf32>
    %30 = vector.shape_cast %29 : vector<8xf32> to vector<8x1xf32>
    %cst_31 = arith.constant 3.200000e+01 : f32
    %31 = vector.broadcast %cst_31 : f32 to vector<8x1xf32>
    %32 = arith.divf %30, %31 : vector<8x1xf32>
    %33 = vector.broadcast %25 : vector<8x1xf32> to vector<8x32xf32>
    %34 = arith.subf %3, %33 : vector<8x32xf32>
    %cst_32 = arith.constant 9.99999996E-13 : f32
    %35 = vector.broadcast %cst_32 : f32 to vector<8x1xf32>
    %36 = arith.addf %32, %35 : vector<8x1xf32>
    %37 = math.rsqrt %36 : vector<8x1xf32>
    %38 = vector.broadcast %37 : vector<8x1xf32> to vector<8x32xf32>
    %39 = arith.mulf %34, %38 : vector<8x32xf32>
    %40 = vector.broadcast %20 : vector<1x32xf32> to vector<8x32xf32>
    %41 = arith.mulf %39, %40 : vector<8x32xf32>
    %42 = vector.broadcast %21 : vector<1x32xf32> to vector<8x32xf32>
    %43 = arith.addf %41, %42 : vector<8x32xf32>
    %44 = vector.extract_strided_slice %3 {offsets = [7, 0], sizes = [1, 32], strides = [1, 1]} : vector<8x32xf32> to vector<1x32xf32>
    %45 = vector.extract_strided_slice %43 {offsets = [7, 0], sizes = [1, 32], strides = [1, 1]} : vector<8x32xf32> to vector<1x32xf32>
    %46 = vector.extract_strided_slice %13 {offsets = [0, 0, 0], sizes = [1, 32, 32], strides = [1, 1, 1]} : vector<4x32x32xf32> to vector<1x32x32xf32>
    %47 = vector.shape_cast %46 : vector<1x32x32xf32> to vector<32x32xf32>
    %cst_33 = arith.constant dense<0.000000e+00> : vector<1x32xf32>
    %48 = tpu.matmul %45, %47, %cst_33 {dimension_numbers = #tpu.dot_dimension_numbers<[1], [0], [0], [1], [0, 0, 1, 1], [], []>} : vector<1x32xf32>, vector<32x32xf32>, vector<1x32xf32> -> vector<1x32xf32>
    %49 = vector.extract_strided_slice %15 {offsets = [0, 0], sizes = [1, 32], strides = [1, 1]} : vector<4x32xf32> to vector<1x32xf32>
    %50 = arith.addf %48, %49 : vector<1x32xf32>
    %51 = vector.extract_strided_slice %13 {offsets = [1, 0, 0], sizes = [1, 32, 32], strides = [1, 1, 1]} : vector<4x32x32xf32> to vector<1x32x32xf32>
    %52 = vector.shape_cast %51 : vector<1x32x32xf32> to vector<32x32xf32>
    %cst_34 = arith.constant dense<0.000000e+00> : vector<8x32xf32>
    %53 = tpu.matmul %43, %52, %cst_34 {dimension_numbers = #tpu.dot_dimension_numbers<[1], [0], [0], [1], [0, 0, 1, 1], [], []>} : vector<8x32xf32>, vector<32x32xf32>, vector<8x32xf32> -> vector<8x32xf32>
    %54 = vector.extract_strided_slice %15 {offsets = [1, 0], sizes = [1, 32], strides = [1, 1]} : vector<4x32xf32> to vector<1x32xf32>
    %55 = vector.broadcast %54 : vector<1x32xf32> to vector<8x32xf32>
    %56 = arith.addf %53, %55 : vector<8x32xf32>
    %57 = vector.extract_strided_slice %13 {offsets = [2, 0, 0], sizes = [1, 32, 32], strides = [1, 1, 1]} : vector<4x32x32xf32> to vector<1x32x32xf32>
    %58 = vector.shape_cast %57 : vector<1x32x32xf32> to vector<32x32xf32>
    %cst_35 = arith.constant dense<0.000000e+00> : vector<8x32xf32>
    %59 = tpu.matmul %43, %58, %cst_35 {dimension_numbers = #tpu.dot_dimension_numbers<[1], [0], [0], [1], [0, 0, 1, 1], [], []>} : vector<8x32xf32>, vector<32x32xf32>, vector<8x32xf32> -> vector<8x32xf32>
    %60 = vector.extract_strided_slice %15 {offsets = [2, 0], sizes = [1, 32], strides = [1, 1]} : vector<4x32xf32> to vector<1x32xf32>
    %61 = vector.broadcast %60 : vector<1x32xf32> to vector<8x32xf32>
    %62 = arith.addf %59, %61 : vector<8x32xf32>
    %63 = vector.broadcast %50 : vector<1x32xf32> to vector<8x32xf32>
    %64 = arith.mulf %56, %63 : vector<8x32xf32>
    %cst_36 = arith.constant dense<0.000000e+00> : vector<8x4xf32>
    %65 = tpu.matmul %64, %6, %cst_36 {dimension_numbers = #tpu.dot_dimension_numbers<[1], [0], [0], [1], [0, 0, 1, 1], [], []>} : vector<8x32xf32>, vector<32x4xf32>, vector<8x4xf32> -> vector<8x4xf32>
    %cst_37 = arith.constant 0.353553385 : f32
    %66 = vector.broadcast %cst_37 : f32 to vector<8x4xf32>
    %67 = arith.mulf %65, %66 : vector<8x4xf32>
    %cst_38 = arith.constant dense<0xFF800000> : vector<4xf32>
    %68 = vector.multi_reduction <maximumf>, %67, %cst_38 [0] : vector<8x4xf32> to vector<4xf32>
    %69 = vector.shape_cast %68 : vector<4xf32> to vector<1x4xf32>
    %70 = vector.broadcast %69 : vector<1x4xf32> to vector<8x4xf32>
    %71 = arith.subf %67, %70 : vector<8x4xf32>
    %72 = math.exp %71 : vector<8x4xf32>
    %cst_39 = arith.constant dense<0.000000e+00> : vector<4xf32>
    %73 = vector.multi_reduction <add>, %72, %cst_39 [0] : vector<8x4xf32> to vector<4xf32>
    %74 = vector.shape_cast %73 : vector<4xf32> to vector<1x4xf32>
    %75 = vector.broadcast %74 : vector<1x4xf32> to vector<8x4xf32>
    %76 = arith.divf %72, %75 : vector<8x4xf32>
    %cst_40 = arith.constant dense<0.000000e+00> : vector<8x32xf32>
    %77 = tpu.matmul %76, %7, %cst_40 {dimension_numbers = #tpu.dot_dimension_numbers<[1], [0], [0], [1], [0, 0, 1, 1], [], []>} : vector<8x4xf32>, vector<4x32xf32>, vector<8x32xf32> -> vector<8x32xf32>
    %78 = arith.mulf %77, %62 : vector<8x32xf32>
    %cst_41 = arith.constant dense<0.000000e+00> : vector<32xf32>
    %79 = vector.multi_reduction <add>, %78, %cst_41 [0] : vector<8x32xf32> to vector<32xf32>
    %80 = vector.shape_cast %79 : vector<32xf32> to vector<1x32xf32>
    %81 = vector.extract_strided_slice %13 {offsets = [3, 0, 0], sizes = [1, 32, 32], strides = [1, 1, 1]} : vector<4x32x32xf32> to vector<1x32x32xf32>
    %82 = vector.shape_cast %81 : vector<1x32x32xf32> to vector<32x32xf32>
    %cst_42 = arith.constant dense<0.000000e+00> : vector<1x32xf32>
    %83 = tpu.matmul %80, %82, %cst_42 {dimension_numbers = #tpu.dot_dimension_numbers<[1], [0], [0], [1], [0, 0, 1, 1], [], []>} : vector<1x32xf32>, vector<32x32xf32>, vector<1x32xf32> -> vector<1x32xf32>
    %84 = vector.extract_strided_slice %15 {offsets = [3, 0], sizes = [1, 32], strides = [1, 1]} : vector<4x32xf32> to vector<1x32xf32>
    %85 = arith.addf %83, %84 : vector<1x32xf32>
    %86 = arith.addf %44, %85 : vector<1x32xf32>
    %87 = vector.extract_strided_slice %9 {offsets = [1, 0], sizes = [1, 32], strides = [1, 1]} : vector<3x32xf32> to vector<1x32xf32>
    %88 = vector.extract_strided_slice %11 {offsets = [1, 0], sizes = [1, 32], strides = [1, 1]} : vector<3x32xf32> to vector<1x32xf32>
    %cst_43 = arith.constant dense<0.000000e+00> : vector<1xf32>
    %89 = vector.multi_reduction <add>, %86, %cst_43 [1] : vector<1x32xf32> to vector<1xf32>
    %90 = vector.shape_cast %89 : vector<1xf32> to vector<1x1xf32>
    %cst_44 = arith.constant 3.200000e+01 : f32
    %91 = vector.broadcast %cst_44 : f32 to vector<1x1xf32>
    %92 = arith.divf %90, %91 : vector<1x1xf32>
    %93 = vector.broadcast %92 : vector<1x1xf32> to vector<1x32xf32>
    %94 = arith.subf %86, %93 : vector<1x32xf32>
    %95 = arith.mulf %94, %94 : vector<1x32xf32>
    %cst_45 = arith.constant dense<0.000000e+00> : vector<1xf32>
    %96 = vector.multi_reduction <add>, %95, %cst_45 [1] : vector<1x32xf32> to vector<1xf32>
    %97 = vector.shape_cast %96 : vector<1xf32> to vector<1x1xf32>
    %cst_46 = arith.constant 3.200000e+01 : f32
    %98 = vector.broadcast %cst_46 : f32 to vector<1x1xf32>
    %99 = arith.divf %97, %98 : vector<1x1xf32>
    %100 = vector.broadcast %92 : vector<1x1xf32> to vector<1x32xf32>
    %101 = arith.subf %86, %100 : vector<1x32xf32>
    %cst_47 = arith.constant 9.99999996E-13 : f32
    %102 = vector.broadcast %cst_47 : f32 to vector<1x1xf32>
    %103 = arith.addf %99, %102 : vector<1x1xf32>
    %104 = math.rsqrt %103 : vector<1x1xf32>
    %105 = vector.broadcast %104 : vector<1x1xf32> to vector<1x32xf32>
    %106 = arith.mulf %101, %105 : vector<1x32xf32>
    %107 = arith.mulf %106, %87 : vector<1x32xf32>
    %108 = arith.addf %107, %88 : vector<1x32xf32>
    %109 = vector.extract_strided_slice %17 {offsets = [0, 0, 0], sizes = [1, 32, 32], strides = [1, 1, 1]} : vector<4x32x32xf32> to vector<1x32x32xf32>
    %110 = vector.shape_cast %109 : vector<1x32x32xf32> to vector<32x32xf32>
    %cst_48 = arith.constant dense<0.000000e+00> : vector<1x32xf32>
    %111 = tpu.matmul %108, %110, %cst_48 {dimension_numbers = #tpu.dot_dimension_numbers<[1], [0], [0], [1], [0, 0, 1, 1], [], []>} : vector<1x32xf32>, vector<32x32xf32>, vector<1x32xf32> -> vector<1x32xf32>
    %112 = vector.extract_strided_slice %19 {offsets = [0, 0], sizes = [1, 32], strides = [1, 1]} : vector<4x32xf32> to vector<1x32xf32>
    %113 = arith.addf %111, %112 : vector<1x32xf32>
    %114 = vector.extract_strided_slice %17 {offsets = [1, 0, 0], sizes = [1, 32, 32], strides = [1, 1, 1]} : vector<4x32x32xf32> to vector<1x32x32xf32>
    %115 = vector.shape_cast %114 : vector<1x32x32xf32> to vector<32x32xf32>
    %cst_49 = arith.constant dense<0.000000e+00> : vector<12x32xf32>
    %116 = tpu.matmul %5, %115, %cst_49 {dimension_numbers = #tpu.dot_dimension_numbers<[1], [0], [0], [1], [0, 0, 1, 1], [], []>} : vector<12x32xf32>, vector<32x32xf32>, vector<12x32xf32> -> vector<12x32xf32>
    %117 = vector.extract_strided_slice %19 {offsets = [1, 0], sizes = [1, 32], strides = [1, 1]} : vector<4x32xf32> to vector<1x32xf32>
    %118 = vector.broadcast %117 : vector<1x32xf32> to vector<12x32xf32>
    %119 = arith.addf %116, %118 : vector<12x32xf32>
    %120 = vector.extract_strided_slice %17 {offsets = [2, 0, 0], sizes = [1, 32, 32], strides = [1, 1, 1]} : vector<4x32x32xf32> to vector<1x32x32xf32>
    %121 = vector.shape_cast %120 : vector<1x32x32xf32> to vector<32x32xf32>
    %cst_50 = arith.constant dense<0.000000e+00> : vector<12x32xf32>
    %122 = tpu.matmul %5, %121, %cst_50 {dimension_numbers = #tpu.dot_dimension_numbers<[1], [0], [0], [1], [0, 0, 1, 1], [], []>} : vector<12x32xf32>, vector<32x32xf32>, vector<12x32xf32> -> vector<12x32xf32>
    %123 = vector.extract_strided_slice %19 {offsets = [2, 0], sizes = [1, 32], strides = [1, 1]} : vector<4x32xf32> to vector<1x32xf32>
    %124 = vector.broadcast %123 : vector<1x32xf32> to vector<12x32xf32>
    %125 = arith.addf %122, %124 : vector<12x32xf32>
    %126 = vector.broadcast %113 : vector<1x32xf32> to vector<12x32xf32>
    %127 = arith.mulf %119, %126 : vector<12x32xf32>
    %cst_51 = arith.constant dense<0.000000e+00> : vector<12x4xf32>
    %128 = tpu.matmul %127, %6, %cst_51 {dimension_numbers = #tpu.dot_dimension_numbers<[1], [0], [0], [1], [0, 0, 1, 1], [], []>} : vector<12x32xf32>, vector<32x4xf32>, vector<12x4xf32> -> vector<12x4xf32>
    %cst_52 = arith.constant 0.353553385 : f32
    %129 = vector.broadcast %cst_52 : f32 to vector<12x4xf32>
    %130 = arith.mulf %128, %129 : vector<12x4xf32>
    %cst_53 = arith.constant dense<0xFF800000> : vector<4xf32>
    %131 = vector.multi_reduction <maximumf>, %130, %cst_53 [0] : vector<12x4xf32> to vector<4xf32>
    %132 = vector.shape_cast %131 : vector<4xf32> to vector<1x4xf32>
    %133 = vector.broadcast %132 : vector<1x4xf32> to vector<12x4xf32>
    %134 = arith.subf %130, %133 : vector<12x4xf32>
    %135 = math.exp %134 : vector<12x4xf32>
    %cst_54 = arith.constant dense<0.000000e+00> : vector<4xf32>
    %136 = vector.multi_reduction <add>, %135, %cst_54 [0] : vector<12x4xf32> to vector<4xf32>
    %137 = vector.shape_cast %136 : vector<4xf32> to vector<1x4xf32>
    %138 = vector.broadcast %137 : vector<1x4xf32> to vector<12x4xf32>
    %139 = arith.divf %135, %138 : vector<12x4xf32>
    %cst_55 = arith.constant dense<0.000000e+00> : vector<12x32xf32>
    %140 = tpu.matmul %139, %7, %cst_55 {dimension_numbers = #tpu.dot_dimension_numbers<[1], [0], [0], [1], [0, 0, 1, 1], [], []>} : vector<12x4xf32>, vector<4x32xf32>, vector<12x32xf32> -> vector<12x32xf32>
    %141 = arith.mulf %140, %125 : vector<12x32xf32>
    %cst_56 = arith.constant dense<0.000000e+00> : vector<32xf32>
    %142 = vector.multi_reduction <add>, %141, %cst_56 [0] : vector<12x32xf32> to vector<32xf32>
    %143 = vector.shape_cast %142 : vector<32xf32> to vector<1x32xf32>
    %144 = vector.extract_strided_slice %17 {offsets = [3, 0, 0], sizes = [1, 32, 32], strides = [1, 1, 1]} : vector<4x32x32xf32> to vector<1x32x32xf32>
    %145 = vector.shape_cast %144 : vector<1x32x32xf32> to vector<32x32xf32>
    %cst_57 = arith.constant dense<0.000000e+00> : vector<1x32xf32>
    %146 = tpu.matmul %143, %145, %cst_57 {dimension_numbers = #tpu.dot_dimension_numbers<[1], [0], [0], [1], [0, 0, 1, 1], [], []>} : vector<1x32xf32>, vector<32x32xf32>, vector<1x32xf32> -> vector<1x32xf32>
    %147 = vector.extract_strided_slice %19 {offsets = [3, 0], sizes = [1, 32], strides = [1, 1]} : vector<4x32xf32> to vector<1x32xf32>
    %148 = arith.addf %146, %147 : vector<1x32xf32>
    %149 = arith.addf %86, %148 : vector<1x32xf32>
    %150 = vector.extract_strided_slice %9 {offsets = [2, 0], sizes = [1, 32], strides = [1, 1]} : vector<3x32xf32> to vector<1x32xf32>
    %151 = vector.extract_strided_slice %11 {offsets = [2, 0], sizes = [1, 32], strides = [1, 1]} : vector<3x32xf32> to vector<1x32xf32>
    %cst_58 = arith.constant dense<0.000000e+00> : vector<1xf32>
    %152 = vector.multi_reduction <add>, %149, %cst_58 [1] : vector<1x32xf32> to vector<1xf32>
    %153 = vector.shape_cast %152 : vector<1xf32> to vector<1x1xf32>
    %cst_59 = arith.constant 3.200000e+01 : f32
    %154 = vector.broadcast %cst_59 : f32 to vector<1x1xf32>
    %155 = arith.divf %153, %154 : vector<1x1xf32>
    %156 = vector.broadcast %155 : vector<1x1xf32> to vector<1x32xf32>
    %157 = arith.subf %149, %156 : vector<1x32xf32>
    %158 = arith.mulf %157, %157 : vector<1x32xf32>
    %cst_60 = arith.constant dense<0.000000e+00> : vector<1xf32>
    %159 = vector.multi_reduction <add>, %158, %cst_60 [1] : vector<1x32xf32> to vector<1xf32>
    %160 = vector.shape_cast %159 : vector<1xf32> to vector<1x1xf32>
    %cst_61 = arith.constant 3.200000e+01 : f32
    %161 = vector.broadcast %cst_61 : f32 to vector<1x1xf32>
    %162 = arith.divf %160, %161 : vector<1x1xf32>
    %163 = vector.broadcast %155 : vector<1x1xf32> to vector<1x32xf32>
    %164 = arith.subf %149, %163 : vector<1x32xf32>
    %cst_62 = arith.constant 9.99999996E-13 : f32
    %165 = vector.broadcast %cst_62 : f32 to vector<1x1xf32>
    %166 = arith.addf %162, %165 : vector<1x1xf32>
    %167 = math.rsqrt %166 : vector<1x1xf32>
    %168 = vector.broadcast %167 : vector<1x1xf32> to vector<1x32xf32>
    %169 = arith.mulf %164, %168 : vector<1x32xf32>
    %170 = arith.mulf %169, %150 : vector<1x32xf32>
    %171 = arith.addf %170, %151 : vector<1x32xf32>
    %c0_63 = arith.constant 0 : index
    %c0_64 = arith.constant 0 : index
    %c0_65 = arith.constant 0 : index
    %172 = vector.load %arg12[%c0_63, %c0_64, %c0_65] : memref<1x32x64xf32, #tpu.memory_space<vmem>>, vector<1x32x64xf32>
    %173 = vector.shape_cast %172 : vector<1x32x64xf32> to vector<32x64xf32>
    %cst_66 = arith.constant dense<0.000000e+00> : vector<1x64xf32>
    %174 = tpu.matmul %171, %173, %cst_66 {dimension_numbers = #tpu.dot_dimension_numbers<[1], [0], [0], [1], [0, 0, 1, 1], [], []>} : vector<1x32xf32>, vector<32x64xf32>, vector<1x64xf32> -> vector<1x64xf32>
    %c0_67 = arith.constant 0 : index
    %c0_68 = arith.constant 0 : index
    %c0_69 = arith.constant 0 : index
    %175 = vector.load %arg13[%c0_67, %c0_68, %c0_69] : memref<1x1x64xf32, #tpu.memory_space<vmem>>, vector<1x1x64xf32>
    %176 = vector.shape_cast %175 : vector<1x1x64xf32> to vector<1x64xf32>
    %177 = arith.addf %174, %176 : vector<1x64xf32>
    %cst_70 = arith.constant 0.000000e+00 : f32
    %178 = vector.broadcast %cst_70 : f32 to vector<1x64xf32>
    %179 = arith.maximumf %177, %178 : vector<1x64xf32>
    %c0_71 = arith.constant 0 : index
    %c0_72 = arith.constant 0 : index
    %c0_73 = arith.constant 0 : index
    %180 = vector.load %arg14[%c0_71, %c0_72, %c0_73] : memref<1x64x32xf32, #tpu.memory_space<vmem>>, vector<1x64x32xf32>
    %181 = vector.shape_cast %180 : vector<1x64x32xf32> to vector<64x32xf32>
    %cst_74 = arith.constant dense<0.000000e+00> : vector<1x32xf32>
    %182 = tpu.matmul %179, %181, %cst_74 {dimension_numbers = #tpu.dot_dimension_numbers<[1], [0], [0], [1], [0, 0, 1, 1], [], []>} : vector<1x64xf32>, vector<64x32xf32>, vector<1x32xf32> -> vector<1x32xf32>
    %183 = arith.addf %149, %182 : vector<1x32xf32>
    %c0_75 = arith.constant 0 : index
    %c0_76 = arith.constant 0 : index
    %c0_77 = arith.constant 0 : index
    %184 = vector.load %arg15[%c0_75, %c0_76, %c0_77] : memref<1x1x32xf32, #tpu.memory_space<vmem>>, vector<1x1x32xf32>
    %185 = vector.shape_cast %184 : vector<1x1x32xf32> to vector<1x32xf32>
    %186 = arith.addf %183, %185 : vector<1x32xf32>
    %c0_i32_78 = arith.constant 0 : i32
    %187 = arith.cmpi eq, %arg1, %c0_i32_78 : i32
    %188 = arith.extui %187 : i1 to i32
    %c0_i32_79 = arith.constant 0 : i32
    %189 = arith.cmpi ne, %188, %c0_i32_79 : i32
    scf.if %189 {
      %c0_83 = arith.constant 0 : index
      %c0_84 = arith.constant 0 : index
      %c0_85 = arith.constant 0 : index
      %196 = vector.load %arg20[%c0_83, %c0_84, %c0_85] : memref<1x8x32xf32, #tpu.memory_space<vmem>>, vector<1x8x32xf32>
      %197 = vector.shape_cast %196 : vector<1x8x32xf32> to vector<8x32xf32>
      %c0_86 = arith.constant 0 : index
      %c0_87 = arith.constant 0 : index
      %c0_88 = arith.constant 0 : index
      %198 = vector.load %arg23[%c0_86, %c0_87, %c0_88] : memref<1x9x32xf32, #tpu.memory_space<vmem>>, vector<1x8x32xf32>
      %199 = vector.shape_cast %198 : vector<1x8x32xf32> to vector<8x32xf32>
      %200 = vector.shape_cast %197 : vector<8x32xf32> to vector<1x8x32xf32>
      tpu.vector_store %arg23[%c0_86, %c0_87, %c0_88], %200 {strides = array<i32>} : memref<1x9x32xf32, #tpu.memory_space<vmem>>, vector<1x8x32xf32>,
      %c0_89 = arith.constant 0 : index
      %c8 = arith.constant 8 : index
      %c0_90 = arith.constant 0 : index
      %201 = vector.load %arg23[%c0_89, %c8, %c0_90] : memref<1x9x32xf32, #tpu.memory_space<vmem>>, vector<1x1x32xf32>
      %202 = vector.shape_cast %201 : vector<1x1x32xf32> to vector<1x32xf32>
      %203 = vector.shape_cast %186 : vector<1x32xf32> to vector<1x1x32xf32>
      tpu.vector_store %arg23[%c0_89, %c8, %c0_90], %203 {strides = array<i32>} : memref<1x9x32xf32, #tpu.memory_space<vmem>>, vector<1x1x32xf32>,
      %204 = vector.extract_strided_slice %197 {offsets = [1, 0], sizes = [7, 32], strides = [1, 1]} : vector<8x32xf32> to vector<7x32xf32>
      %c0_91 = arith.constant 0 : index
      %c0_92 = arith.constant 0 : index
      %205 = vector.load %arg25[%c0_91, %c0_92] : memref<8x32xf32, #tpu.memory_space<vmem>>, vector<7x32xf32>
      tpu.vector_store %arg25[%c0_91, %c0_92], %204 {strides = array<i32>} : memref<8x32xf32, #tpu.memory_space<vmem>>, vector<7x32xf32>,
      %c7 = arith.constant 7 : index
      %c0_93 = arith.constant 0 : index
      %206 = vector.load %arg25[%c7, %c0_93] : memref<8x32xf32, #tpu.memory_space<vmem>>, vector<1x32xf32>
      tpu.vector_store %arg25[%c7, %c0_93], %186 {strides = array<i32>} : memref<8x32xf32, #tpu.memory_space<vmem>>, vector<1x32xf32>,
    } else {
    }
    %c1_i32 = arith.constant 1 : i32
    %190 = arith.cmpi eq, %arg1, %c1_i32 : i32
    %191 = arith.extui %190 : i1 to i32
    %c0_i32_80 = arith.constant 0 : i32
    %192 = arith.cmpi ne, %191, %c0_i32_80 : i32
    scf.if %192 {
      %c0_83 = arith.constant 0 : index
      %c0_84 = arith.constant 0 : index
      %c0_85 = arith.constant 0 : index
      %196 = vector.load %arg21[%c0_83, %c0_84, %c0_85] : memref<1x8x32xf32, #tpu.memory_space<vmem>>, vector<1x8x32xf32>
      %197 = vector.shape_cast %196 : vector<1x8x32xf32> to vector<8x32xf32>
      %c0_86 = arith.constant 0 : index
      %c0_87 = arith.constant 0 : index
      %c0_88 = arith.constant 0 : index
      %198 = vector.load %arg24[%c0_86, %c0_87, %c0_88] : memref<1x9x32xf32, #tpu.memory_space<vmem>>, vector<1x8x32xf32>
      %199 = vector.shape_cast %198 : vector<1x8x32xf32> to vector<8x32xf32>
      %200 = vector.shape_cast %197 : vector<8x32xf32> to vector<1x8x32xf32>
      tpu.vector_store %arg24[%c0_86, %c0_87, %c0_88], %200 {strides = array<i32>} : memref<1x9x32xf32, #tpu.memory_space<vmem>>, vector<1x8x32xf32>,
      %c0_89 = arith.constant 0 : index
      %c8 = arith.constant 8 : index
      %c0_90 = arith.constant 0 : index
      %201 = vector.load %arg24[%c0_89, %c8, %c0_90] : memref<1x9x32xf32, #tpu.memory_space<vmem>>, vector<1x1x32xf32>
      %202 = vector.shape_cast %201 : vector<1x1x32xf32> to vector<1x32xf32>
      %203 = vector.shape_cast %186 : vector<1x32xf32> to vector<1x1x32xf32>
      tpu.vector_store %arg24[%c0_89, %c8, %c0_90], %203 {strides = array<i32>} : memref<1x9x32xf32, #tpu.memory_space<vmem>>, vector<1x1x32xf32>,
      %204 = vector.extract_strided_slice %197 {offsets = [1, 0], sizes = [7, 32], strides = [1, 1]} : vector<8x32xf32> to vector<7x32xf32>
      %c0_91 = arith.constant 0 : index
      %c0_92 = arith.constant 0 : index
      %205 = vector.load %arg25[%c0_91, %c0_92] : memref<8x32xf32, #tpu.memory_space<vmem>>, vector<7x32xf32>
      tpu.vector_store %arg25[%c0_91, %c0_92], %204 {strides = array<i32>} : memref<8x32xf32, #tpu.memory_space<vmem>>, vector<7x32xf32>,
      %c7 = arith.constant 7 : index
      %c0_93 = arith.constant 0 : index
      %206 = vector.load %arg25[%c7, %c0_93] : memref<8x32xf32, #tpu.memory_space<vmem>>, vector<1x32xf32>
      tpu.vector_store %arg25[%c7, %c0_93], %186 {strides = array<i32>} : memref<8x32xf32, #tpu.memory_space<vmem>>, vector<1x32xf32>,
    } else {
    }
    %c1_i32_81 = arith.constant 1 : i32
    %193 = arith.cmpi eq, %arg1, %c1_i32_81 : i32
    %194 = arith.extui %193 : i1 to i32
    %c0_i32_82 = arith.constant 0 : i32
    %195 = arith.cmpi ne, %194, %c0_i32_82 : i32
    scf.if %195 {
      %c0_83 = arith.constant 0 : index
      %c0_84 = arith.constant 0 : index
      %196 = vector.load %arg16[%c0_83, %c0_84] : memref<1x32xf32, #tpu.memory_space<vmem>>, vector<1x32xf32>
      %c0_85 = arith.constant 0 : index
      %c0_86 = arith.constant 0 : index
      %197 = vector.load %arg17[%c0_85, %c0_86] : memref<1x32xf32, #tpu.memory_space<vmem>>, vector<1x32xf32>
      %cst_87 = arith.constant dense<0.000000e+00> : vector<1xf32>
      %198 = vector.multi_reduction <add>, %186, %cst_87 [1] : vector<1x32xf32> to vector<1xf32>
      %199 = vector.shape_cast %198 : vector<1xf32> to vector<1x1xf32>
      %cst_88 = arith.constant 3.200000e+01 : f32
      %200 = vector.broadcast %cst_88 : f32 to vector<1x1xf32>
      %201 = arith.divf %199, %200 : vector<1x1xf32>
      %202 = vector.broadcast %201 : vector<1x1xf32> to vector<1x32xf32>
      %203 = arith.subf %186, %202 : vector<1x32xf32>
      %204 = arith.mulf %203, %203 : vector<1x32xf32>
      %cst_89 = arith.constant dense<0.000000e+00> : vector<1xf32>
      %205 = vector.multi_reduction <add>, %204, %cst_89 [1] : vector<1x32xf32> to vector<1xf32>
      %206 = vector.shape_cast %205 : vector<1xf32> to vector<1x1xf32>
      %cst_90 = arith.constant 3.200000e+01 : f32
      %207 = vector.broadcast %cst_90 : f32 to vector<1x1xf32>
      %208 = arith.divf %206, %207 : vector<1x1xf32>
      %209 = vector.broadcast %201 : vector<1x1xf32> to vector<1x32xf32>
      %210 = arith.subf %186, %209 : vector<1x32xf32>
      %cst_91 = arith.constant 9.99999996E-13 : f32
      %211 = vector.broadcast %cst_91 : f32 to vector<1x1xf32>
      %212 = arith.addf %208, %211 : vector<1x1xf32>
      %213 = math.rsqrt %212 : vector<1x1xf32>
      %214 = vector.broadcast %213 : vector<1x1xf32> to vector<1x32xf32>
      %215 = arith.mulf %210, %214 : vector<1x32xf32>
      %216 = arith.mulf %215, %196 : vector<1x32xf32>
      %217 = arith.addf %216, %197 : vector<1x32xf32>
      %c0_92 = arith.constant 0 : index
      %c0_93 = arith.constant 0 : index
      %218 = vector.load %arg18[%c0_92, %c0_93] : memref<32x50xf32, #tpu.memory_space<vmem>>, vector<32x50xf32>
      %cst_94 = arith.constant dense<0.000000e+00> : vector<1x50xf32>
      %219 = tpu.matmul %217, %218, %cst_94 {dimension_numbers = #tpu.dot_dimension_numbers<[1], [0], [0], [1], [0, 0, 1, 1], [], []>} : vector<1x32xf32>, vector<32x50xf32>, vector<1x50xf32> -> vector<1x50xf32>
      %c0_95 = arith.constant 0 : index
      %c0_96 = arith.constant 0 : index
      %220 = vector.load %arg19[%c0_95, %c0_96] : memref<1x50xf32, #tpu.memory_space<vmem>>, vector<1x50xf32>
      %221 = arith.addf %219, %220 : vector<1x50xf32>
      %cst_97 = arith.constant dense<0xFF800000> : vector<1xf32>
      %222 = vector.multi_reduction <maximumf>, %221, %cst_97 [1] : vector<1x50xf32> to vector<1xf32>
      %223 = vector.shape_cast %222 : vector<1xf32> to vector<1x1xf32>
      %224 = vector.broadcast %223 : vector<1x1xf32> to vector<1x50xf32>
      %225 = arith.subf %221, %224 : vector<1x50xf32>
      %226 = math.exp %225 : vector<1x50xf32>
      %cst_98 = arith.constant dense<0.000000e+00> : vector<1xf32>
      %227 = vector.multi_reduction <add>, %226, %cst_98 [1] : vector<1x50xf32> to vector<1xf32>
      %228 = vector.shape_cast %227 : vector<1xf32> to vector<1x1xf32>
      %229 = math.log %228 : vector<1x1xf32>
      %230 = arith.addf %223, %229 : vector<1x1xf32>
      %231 = vector.broadcast %230 : vector<1x1xf32> to vector<1x50xf32>
      %232 = arith.subf %221, %231 : vector<1x50xf32>
      %c0_99 = arith.constant 0 : index
      %c0_100 = arith.constant 0 : index
      %c0_101 = arith.constant 0 : index
      %233 = vector.load %arg22[%c0_99, %c0_100, %c0_101] : memref<1x1x50xf32, #tpu.memory_space<vmem>>, vector<1x1x50xf32>
      %234 = vector.shape_cast %233 : vector<1x1x50xf32> to vector<1x50xf32>
      %235 = vector.shape_cast %232 : vector<1x50xf32> to vector<1x1x50xf32>
      tpu.vector_store %arg22[%c0_99, %c0_100, %c0_101], %235 {strides = array<i32>} : memref<1x1x50xf32, #tpu.memory_space<vmem>>, vector<1x1x50xf32>,
    } else {
    }
    return
  }
  func.func @transform_0(%arg0: i32, %arg1: i32) -> (i32, i32, i32) {
    %c0_i32 = arith.constant 0 : i32
    %c0_i32_0 = arith.constant 0 : i32
    %c0_i32_1 = arith.constant 0 : i32
    return %arg0, %c0_i32, %c0_i32_0 : i32, i32, i32
  }
  func.func @transform_1(%arg0: i32, %arg1: i32) -> (i32, i32, i32) {
    %c0_i32 = arith.constant 0 : i32
    %c0_i32_0 = arith.constant 0 : i32
    %c0_i32_1 = arith.constant 0 : i32
    return %arg0, %c0_i32, %c0_i32_0 : i32, i32, i32
  }
  func.func @transform_2(%arg0: i32, %arg1: i32) -> (i32, i32) {
    %c0_i32 = arith.constant 0 : i32
    %c0_i32_0 = arith.constant 0 : i32
    %c0_i32_1 = arith.constant 0 : i32
    return %c0_i32, %c0_i32_0 : i32, i32
  }
  func.func @transform_3(%arg0: i32, %arg1: i32) -> (i32, i32) {
    %c0_i32 = arith.constant 0 : i32
    %c0_i32_0 = arith.constant 0 : i32
    %c0_i32_1 = arith.constant 0 : i32
    return %c0_i32, %c0_i32_0 : i32, i32
  }
  func.func @transform_4(%arg0: i32, %arg1: i32) -> (i32, i32, i32) {
    %c0_i32 = arith.constant 0 : i32
    %c0_i32_0 = arith.constant 0 : i32
    %c0_i32_1 = arith.constant 0 : i32
    return %arg1, %c0_i32, %c0_i32_0 : i32, i32, i32
  }
  func.func @transform_5(%arg0: i32, %arg1: i32) -> (i32, i32, i32) {
    %c0_i32 = arith.constant 0 : i32
    %c0_i32_0 = arith.constant 0 : i32
    %c0_i32_1 = arith.constant 0 : i32
    return %arg1, %c0_i32, %c0_i32_0 : i32, i32, i32
  }
  func.func @transform_6(%arg0: i32, %arg1: i32) -> (i32, i32, i32, i32) {
    %c0_i32 = arith.constant 0 : i32
    %c0_i32_0 = arith.constant 0 : i32
    %c0_i32_1 = arith.constant 0 : i32
    %c0_i32_2 = arith.constant 0 : i32
    return %arg1, %c0_i32, %c0_i32_0, %c0_i32_1 : i32, i32, i32, i32
  }
  func.func @transform_7(%arg0: i32, %arg1: i32) -> (i32, i32, i32) {
    %c0_i32 = arith.constant 0 : i32
    %c0_i32_0 = arith.constant 0 : i32
    %c0_i32_1 = arith.constant 0 : i32
    return %arg1, %c0_i32, %c0_i32_0 : i32, i32, i32
  }
  func.func @transform_8(%arg0: i32, %arg1: i32) -> (i32, i32, i32, i32) {
    %c0_i32 = arith.constant 0 : i32
    %c0_i32_0 = arith.constant 0 : i32
    %c0_i32_1 = arith.constant 0 : i32
    %c0_i32_2 = arith.constant 0 : i32
    return %arg1, %c0_i32, %c0_i32_0, %c0_i32_1 : i32, i32, i32, i32
  }
  func.func @transform_9(%arg0: i32, %arg1: i32) -> (i32, i32, i32) {
    %c0_i32 = arith.constant 0 : i32
    %c0_i32_0 = arith.constant 0 : i32
    %c0_i32_1 = arith.constant 0 : i32
    return %arg1, %c0_i32, %c0_i32_0 : i32, i32, i32
  }
  func.func @transform_10(%arg0: i32, %arg1: i32) -> (i32, i32, i32) {
    %c0_i32 = arith.constant 0 : i32
    %c0_i32_0 = arith.constant 0 : i32
    %c0_i32_1 = arith.constant 0 : i32
    return %arg1, %c0_i32, %c0_i32_0 : i32, i32, i32
  }
  func.func @transform_11(%arg0: i32, %arg1: i32) -> (i32, i32, i32) {
    %c0_i32 = arith.constant 0 : i32
    %c0_i32_0 = arith.constant 0 : i32
    %c0_i32_1 = arith.constant 0 : i32
    return %arg1, %c0_i32, %c0_i32_0 : i32, i32, i32
  }
  func.func @transform_12(%arg0: i32, %arg1: i32) -> (i32, i32, i32) {
    %c0_i32 = arith.constant 0 : i32
    %c0_i32_0 = arith.constant 0 : i32
    %c0_i32_1 = arith.constant 0 : i32
    return %arg1, %c0_i32, %c0_i32_0 : i32, i32, i32
  }
  func.func @transform_13(%arg0: i32, %arg1: i32) -> (i32, i32, i32) {
    %c0_i32 = arith.constant 0 : i32
    %c0_i32_0 = arith.constant 0 : i32
    %c0_i32_1 = arith.constant 0 : i32
    return %arg1, %c0_i32, %c0_i32_0 : i32, i32, i32
  }
  func.func @transform_14(%arg0: i32, %arg1: i32) -> (i32, i32) {
    %c0_i32 = arith.constant 0 : i32
    %c0_i32_0 = arith.constant 0 : i32
    %c0_i32_1 = arith.constant 0 : i32
    return %c0_i32, %c0_i32_0 : i32, i32
  }
  func.func @transform_15(%arg0: i32, %arg1: i32) -> (i32, i32) {
    %c0_i32 = arith.constant 0 : i32
    %c0_i32_0 = arith.constant 0 : i32
    %c0_i32_1 = arith.constant 0 : i32
    return %c0_i32, %c0_i32_0 : i32, i32
  }
  func.func @transform_16(%arg0: i32, %arg1: i32) -> (i32, i32) {
    %c0_i32 = arith.constant 0 : i32
    %c0_i32_0 = arith.constant 0 : i32
    %c0_i32_1 = arith.constant 0 : i32
    return %c0_i32, %c0_i32_0 : i32, i32
  }
  func.func @transform_17(%arg0: i32, %arg1: i32) -> (i32, i32) {
    %c0_i32 = arith.constant 0 : i32
    %c0_i32_0 = arith.constant 0 : i32
    %c0_i32_1 = arith.constant 0 : i32
    return %c0_i32, %c0_i32_0 : i32, i32
  }
  func.func @transform_18(%arg0: i32, %arg1: i32) -> (i32, i32, i32) {
    %c0_i32 = arith.constant 0 : i32
    %c0_i32_0 = arith.constant 0 : i32
    %c0_i32_1 = arith.constant 0 : i32
    return %arg0, %c0_i32, %c0_i32_0 : i32, i32, i32
  }
  func.func @transform_19(%arg0: i32, %arg1: i32) -> (i32, i32, i32) {
    %c0_i32 = arith.constant 0 : i32
    %c0_i32_0 = arith.constant 0 : i32
    %c0_i32_1 = arith.constant 0 : i32
    return %arg0, %c0_i32, %c0_i32_0 : i32, i32, i32
  }
  func.func @transform_20(%arg0: i32, %arg1: i32) -> (i32, i32, i32) {
    %c0_i32 = arith.constant 0 : i32
    %c0_i32_0 = arith.constant 0 : i32
    %c0_i32_1 = arith.constant 0 : i32
    return %arg0, %c0_i32, %c0_i32_0 : i32, i32, i32
  }
  func.func @transform_21(%arg0: i32, %arg1: i32) -> (i32, i32, i32) {
    %c0_i32 = arith.constant 0 : i32
    %c0_i32_0 = arith.constant 0 : i32
    %c0_i32_1 = arith.constant 0 : i32
    return %arg0, %c0_i32, %c0_i32_0 : i32, i32, i32
  }
  func.func @transform_22(%arg0: i32, %arg1: i32) -> (i32, i32, i32) {
    %c0_i32 = arith.constant 0 : i32
    %c0_i32_0 = arith.constant 0 : i32
    %c0_i32_1 = arith.constant 0 : i32
    return %arg0, %c0_i32, %c0_i32_0 : i32, i32, i32
  }
}

</mosaic_0001>

<bundles_post_ra>
// kernel: xformer_decoder_forward.1
= control target key start
LH: loop header
LB: loop body
LE: loop exit
PB: predicated region body
PF: predicated region fallthrough
CT: control target
= control target key end

     0   :  { %s4813_s0 = inlined_call_operand.vmem [shape: f32[2,8,32], index: 0, kind: input, shape index: {}]   ;;  %s4814_s1 = inlined_call_operand.vmem [shape: f32[2,12,32], index: 1, kind: input, shape index: {}]   ;;  %s4815_s2 = inlined_call_operand.vmem [shape: f32[32,4], index: 2, kind: input, shape index: {}]   ;;  %s4816_s3 = inlined_call_operand.hbm [shape: f32[4,32], index: 3, kind: input, shape index: {}]   ;;  %s4817_s4 = inlined_call_operand.vmem [shape: f32[2,3,32], index: 4, kind: input, shape index: {}]   ;;  %s4818_s5 = inlined_call_operand.vmem [shape: f32[2,3,32], index: 5, kind: input, shape index: {}]   ;;  %s4819_s6 = inlined_call_operand.vmem [shape: f32[2,4,32,32], index: 6, kind: input, shape index: {}]   ;;  %s4820_s7 = inlined_call_operand.hbm [shape: f32[2,4,32], index: 7, kind: input, shape index: {}]   ;;  %s4821_s8 = inlined_call_operand.vmem [shape: f32[2,4,32,32], index: 8, kind: input, shape index: {}]   ;;  %s4822_s9 = inlined_call_operand.hbm [shape: f32[2,4,32], index: 9, kind: input, shape index: {}]   ;;  %s4823_s10 = inlined_call_operand.vmem [shape: f32[2,32,64], index: 10, kind: input, shape index: {}]   ;;  %s4824_s11 = inlined_call_operand.hbm [shape: f32[2,1,64], index: 11, kind: input, shape index: {}]   ;;  %s4825_s12 = inlined_call_operand.vmem [shape: f32[2,64,32], index: 12, kind: input, shape index: {}]   ;;  %s4826_s13 = inlined_call_operand.hbm [shape: f32[2,1,32], index: 13, kind: input, shape index: {}]   ;;  %s4827_s14 = inlined_call_operand.vmem [shape: f32[1,32], index: 14, kind: input, shape index: {}]   ;;  %s4828_s15 = inlined_call_operand.hbm [shape: f32[1,32], index: 15, kind: input, shape index: {}]   ;;  %s4829_s16 = inlined_call_operand.vmem [shape: f32[32,50], index: 16, kind: input, shape index: {}]   ;;  %s4830_s17 = inlined_call_operand.vmem [shape: f32[1,50], index: 17, kind: input, shape index: {}]   ;;  %s4831_s18 = inlined_call_operand.hbm [shape: f32[2,8,32], index: 18, kind: input, shape index: {}]   ;;  %s4832_s19 = inlined_call_operand.hbm [shape: f32[2,8,32], index: 19, kind: input, shape index: {}]   ;;  %s4833_s20 = inlined_call_operand.hbm [shape: f32[2,1,50], index: 20, kind: output, shape index: {0}]   ;;  %s4834_s21 = inlined_call_operand.vmem [shape: f32[2,9,32], index: 21, kind: output, shape index: {1}]   ;;  %s4835_s22 = inlined_call_operand.vmem [shape: f32[2,9,32], index: 22, kind: output, shape index: {2}]  }
   0x1   :  { %4882 = sst [smem:[#allocation46_spill]] %s4813_s0 }
   0x2   :  { %4883 = sst [smem:[#allocation47_spill]] %s4814_s1 }
   0x3   :  { %4884 = sst [smem:[#allocation48_spill]] %s4815_s2 }
   0x4   :  { %4885 = sst [smem:[#allocation49_spill]] %s4816_s3 }
   0x5   :  { %4886 = sst [smem:[#allocation50_spill]] %s4817_s4 }
   0x6   :  { %4887 = sst [smem:[#allocation51_spill]] %s4818_s5 }
   0x7   :  { %4888 = sst [smem:[#allocation52_spill]] %s4819_s6 }
   0x8   :  { %4889 = sst [smem:[#allocation53_spill]] %s4820_s7 }
   0x9   :  { %4890 = sst [smem:[#allocation54_spill]] %s4821_s8 }
   0xa   :  { %4891 = sst [smem:[#allocation55_spill]] %s4822_s9 }
   0xb   :  { %4892 = sst [smem:[#allocation56_spill]] %s4823_s10 }
   0xc   :  { %4893 = sst [smem:[#allocation57_spill]] %s4824_s11 }
   0xd   :  { %4894 = sst [smem:[#allocation58_spill]] %s4825_s12 }
   0xe   :  { %4895 = sst [smem:[#allocation59_spill]] %s4826_s13 }
   0xf   :  { %4896 = sst [smem:[#allocation60_spill]] %s4827_s14 }
  0x10   :  { %4897 = sst [smem:[#allocation61_spill]] %s4828_s15 }
  0x11   :  { %4898 = sst [smem:[#allocation62_spill]] %s4829_s16 }
  0x12   :  { %4899 = sst [smem:[#allocation63_spill]] %s4830_s17 }
  0x13   :  { %4900 = sst [smem:[#allocation64_spill]] %s4831_s18 }
  0x14   :  { %4901 = sst [smem:[#allocation65_spill]] %s4832_s19 }
  0x15   :  { %4902 = sst [smem:[#allocation66_spill]] %s4833_s20 }
  0x16   :  { %4903 = sst [smem:[#allocation67_spill]] %s4834_s21 }
  0x17   :  { %4904 = sst [smem:[#allocation68_spill]] %s4835_s22 }
  0x18   :  { %28 = vsyncpa [#allocation4], 0 }
  0x19   :  { %29 = vsyncpa [#allocation7], 0 }
  0x1a   :  { %31 = vsyncpa [#allocation7 + $0x1], 0 }
  0x1b   :  { %32 = vsyncpa [#allocation10], 0 }
  0x1c   :  { %34 = vsyncpa [#allocation10 + $0x1], 0 }
  0x1d   :  { %35 = vsyncpa [#allocation13], 0 }
  0x1e   :  { %36 = vsyncpa [#allocation5], 0 }
  0x1f   :  { %38 = vsyncpa [#allocation5 + $0x1], 0  ;;  %s3990_s3 = smov 0   ;;  %s3992_s28 = smov 0  }
  0x20   :  { %s3994_s29 = smov 0   ;;  %s3996_s30 = smov 0  }
  0x21   :  { %s3998_s4 = smov 0   ;;  %s4000_s0 = smov 0  }
  0x22   :  { %s4002_s23 = smov 0   ;;  %s4004_s1 = smov 0  }
  0x23   :  { %s4006_s5 = smov 0   ;;  %s4008_s24 = smov 0  }
  0x24   :  { %s4010_s6 = smov 0  }
  0x25 LB: > { %4905 = sst [smem:[#allocation24_spill]] %s3818_s3  ;;  %s53_s25 = sadd.s32 1, %s3850_s5  ;;  %s3858_s6 = sphi %s4010_s6, %s44_s6   ;;  %s3854_s24 = sphi %s4008_s24, %s5013_s24   ;;  %s3850_s5 = sphi %s4006_s5, %s5012_s5   ;;  %s3846_s1 = sphi %s4004_s1, %s5011_s1   ;;  %s3842_s23 = sphi %s4002_s23, %s5010_s23   ;;  %s3838_s0 = sphi %s4000_s0, %s5009_s0   ;;  %s3834_s4 = sphi %s3998_s4, %s5008_s4   ;;  %s3830_s30 = sphi %s3996_s30, %s5007_s30   ;;  %s3826_s29 = sphi %s3994_s29, %s5006_s29   ;;  %s3822_s28 = sphi %s3992_s28, %s5005_s28   ;;  %s3818_s3 = sphi %s3990_s3, %s5004_s3  }
  0x26   : > { %4906 = sst [smem:[#allocation25_spill]] %s3822_s28  ;;  %s235_s26 = sadd.s32 1, %s3838_s0 }
  0x27   : > { %4907 = sst [smem:[#allocation26_spill]] %s3826_s29  ;;  %p4047_p0 = scmp.ge.s32.totalorder %s53_s25, 2 }
  0x28   : > { %4908 = sst [smem:[#allocation27_spill]] %s3834_s4  ;;  %p242_p1 = scmp.ne.s32.totalorder %s3838_s0, %s3834_s4 }
  0x29   : > { %4909 = sst [smem:[#allocation28_spill]] %s3838_s0  ;;  %p4846_p2 = scmp.eq.s32.totalorder %s3858_s6, 0 }
  0x2a   : > { %4910 = sst [smem:[#allocation29_spill]] %s3842_s23  ;;  %s5015_s25 = smov (%p4047_p0, %s53_s25), 0 }
  0x2b   : > { %4911 = sst [smem:[#allocation30_spill]] %s3846_s1  ;;  %p244_p3 = por %p4846_p2, %p242_p1 }
  0x2c   : > { %4912 = sst [smem:[#allocation31_spill]] %s3850_s5  ;;  %p4845_p4 = scmp.lt.s32.totalorder %s3858_s6, 4 }
  0x2d   : > { %4913 = sst [smem:[#allocation32_spill]] %s3854_s24  ;;  %s232_s27 = ssub.s32 %s3850_s5, %s5015_s25 }
  0x2e   : > { %4914 = sst [smem:[#allocation33_spill]] %s3858_s6  ;;  %s4064_s20 = sand.u32 1, %s3858_s6  }
  0x2f   : > { %s4915_s2 = scalar_select %p4047_p0, 1, 0 }
  0x30   : > { %4916 = sst [smem:[#allocation34_spill]] %s5015_s25  ;;  %p233_p5 = scmp.eq.s32.totalorder %s232_s27, 0 }
  0x31   : > { %s4067_s17 = sand.u32 1, %s3838_s0   ;;  %s4841_s14 = sshll.u32 %s3850_s5, 6 }
  0x32   : > { %s4071_s16 = scalar_select %p233_p5, %s3838_s0, %s235_s26  }
  0x33   : > { %s4843_s22 = sshll.u32 %s4067_s17, 2  ;;  %s4918_s7 = sld [smem:[#allocation53_spill]] }
  0x34   : > { %4917 = sst [smem:[#allocation35_spill]] %s4071_s16  ;;  %p4083_p6 = pnand %p4845_p4, %p244_p3 }
  0x35   : > { %s717_s26 = scalar_lea.vmem [#allocation6], %s4843_s22  ;;  %s4092_s16 = scalar_lea.sflag [#allocation7], %s4064_s20 }
  0x36   : > { %s4919_s27 = scalar_select %p4083_p6, 1, 0 }
  0x37   : > { %s724_s25 = sshll.u32 %s717_s26, 4  ;;  %4920 = sst [smem:[#allocation36_spill]] %s4092_s16  ;;  %s4089_s25 = int_to_ptr.vmem [resolvable:$true] %s724_s25 }
  0x38   : > { %p4098_p8 = pneg %p4083_p6 }
  0x39   : > { %s4079_s10 = scalar_lea.hbm %s4918_s7, %s4841_s14  ;;  %s3485_s22 = scalar_lea.hbm %s4918_s7, 128 }
  0x3a   : > { %s3480_s12 = scalar_lea.hbm %s4079_s10, 64  ;;  %p3486_p11 = scmp.lt.u32.totalorder %s4079_s10, %s4918_s7 }
  0x3b   : > { %p3481_p7 = scmp.ne.s32.totalorder %s4079_s10, %s3480_s12  ;;  %p3487_p12 = scmp.lt.u32.totalorder %s3485_s22, %s3480_s12 }
  0x3c   : > { %s4921_s21 = scalar_select %p4098_p8, 1, 0 }
  0x3d   : > { %p3483_p9 = pnand %p4098_p8, %p3481_p7  ;;  %p3488_p13 = por %p3487_p12, %p3486_p11 }
  0x3e   : > { %p3489_p1 = scmp.lt.u32.totalorder %s3480_s12, %s4079_s10 }
  0x3f   : > { %p3484_p10 = pneg %p3483_p9 }
  0x40   : > { %p3490_p3 = por %p3489_p1, %p3488_p13 }
  0x42   : > { %p3491_p5 = pnand %p3490_p3, %p3484_p10 }
  0x44   : > { %3494 = shalt.err (!%p3491_p5)
}
  0x45   : > { %s3495_s23 = scalar_lea.vmem %s4089_s25, 64  ;;  %s3860_s14 = smov [#allocation6]  }
  0x46   : > { %p3496_p7 = scmp.ne.s32.totalorder %s4089_s25, %s3495_s23  ;;  %s3500_s0 = sshll.u32 %s3860_s14, 4  ;;  %s3501_s0 = int_to_ptr.vmem [resolvable:$false] %s3500_s0 }
  0x47   : > { %s3502_s8 = scalar_lea.vmem %s3501_s0, 128  ;;  %p3503_p2 = scmp.lt.s32.totalorder %s4089_s25, %s3501_s0 }
  0x48   : > { %p3498_p9 = pnand %p3496_p7, %p4098_p8  ;;  %p3504_p0 = scmp.lt.s32.totalorder %s3502_s8, %s3495_s23 }
  0x4a   : > { %p3499_p4 = pneg %p3498_p9  ;;  %p3505_p11 = por %p3504_p0, %p3503_p2 }
  0x4c   : > { %p3506_p12 = pnand %p3505_p11, %p3499_p4 }
  0x4e   : > { %3509 = shalt.err (!%p3506_p12)
}
  0x4f   : > { %3336 = dma.hbm_to_vmem [thread:$0]  (!%p4083_p6), %s4079_s10, 64, %s4089_s25, %s4092_s16  }
  0x50   : > { %s4922_s22 = sshll.u32 %s3850_s5, 6  ;;  %s4923_s9 = sld [smem:[#allocation55_spill]] }
  0x51   : > { %s4130_s14 = sadd.s32 4294967295, %s3858_s6   ;;  %s2900_s0 = sadd.s32 4294967294, %s3858_s6  }
  0x52   : > { %p248_p0 = scmp.ne.s32.totalorder %s3834_s4, %s3830_s30  ;;  %p4853_p2 = scmp.eq.s32.totalorder %s4130_s14, 0 }
  0x53   : > { %p514_p4 = scmp.ne.s32.totalorder %s3822_s28, %s3818_s3  ;;  %p570_p13 = scmp.eq.s32.totalorder %s2900_s0, 3 }
  0x54   : > { %p4141_p1 = por %p4853_p2, %p248_p0  ;;  %p2901_p7 = scmp.ge.s32.totalorder %s3858_s6, 1 }
  0x55   : > { %p4147_p3 = por %p514_p4, %p4853_p2  ;;  %p4151_p5 = por %p570_p13, %p514_p4 }
  0x56   : > { %s4127_s26 = scalar_lea.hbm %s4923_s9, %s4922_s22  ;;  %p629_p9 = scmp.lt.s32.totalorder %s3858_s6, 5 }
  0x57   : > { %s4924_s10 = scalar_select %p4141_p1, 1, 0 }
  0x58   : > { %s4926_s25 = scalar_select %p4147_p3, 1, 0 }
  0x59   : > { %4925 = sst [smem:[#allocation37_spill]] %s4924_s10  ;;  %s4930_s30 = sshll.u32 %s4067_s17, 2 }
  0x5a   : > { %4927 = sst [smem:[#allocation38_spill]] %s4926_s25  ;;  %s743_s22 = scalar_lea.vmem [#allocation8], %s4930_s30 }
  0x5b   : > { %s4928_s8 = scalar_select %p4151_p5, 1, 0 }
  0x5c   : > { %s750_s23 = sshll.u32 %s743_s22, 4  ;;  %p4159_p11 = pnand %p2901_p7, %p629_p9  ;;  %s751_s23 = int_to_ptr.vmem [resolvable:$true] %s750_s23 }
  0x5d   : > { %4929 = sst [smem:[#allocation39_spill]] %s4928_s8  ;;  %s3861_s0 = smov [#allocation3]  }
  0x5e   : > { %s4931_s12 = scalar_select %p4159_p11, 1, 0 }
  0x5f   : > { %s645_s7 = sshll.u32 %s3861_s0, 4  ;;  %s3510_s8 = scalar_lea.hbm %s4127_s26, 64  ;;  %s4163_s7 = int_to_ptr.vmem [resolvable:$true] %s645_s7 }
  0x60   : > { %4932 = sst [smem:[#allocation40_spill]] %s4931_s12  ;;  %p3511_p0 = scmp.ne.s32.totalorder %s4127_s26, %s3510_s8 }
  0x61   : > { %s3515_s22 = scalar_lea.hbm %s4923_s9, 128  ;;  %p3516_p7 = scmp.lt.u32.totalorder %s4127_s26, %s4923_s9 }
  0x62   : > { %p3513_p4 = pnand %p3511_p0, %p4098_p8  ;;  %p3517_p9 = scmp.lt.u32.totalorder %s3515_s22, %s3510_s8 }
  0x63   : > { %p3519_p2 = scmp.lt.u32.totalorder %s3510_s8, %s4127_s26 }
  0x64   : > { %p3514_p13 = pneg %p3513_p4  ;;  %p3518_p10 = por %p3517_p9, %p3516_p7 }
  0x66   : > { %p3520_p5 = por %p3519_p2, %p3518_p10 }
  0x68   : > { %p3521_p3 = pnand %p3520_p5, %p3514_p13 }
  0x6a   : > { %3524 = shalt.err (!%p3521_p3)
}
  0x6b   : > { %s3525_s0 = scalar_lea.vmem %s751_s23, 64  ;;  %s3862_s10 = smov [#allocation8]  }
  0x6c   : > { %p3526_p12 = scmp.ne.s32.totalorder %s751_s23, %s3525_s0  ;;  %s3530_s4 = sshll.u32 %s3862_s10, 4  ;;  %s3531_s4 = int_to_ptr.vmem [resolvable:$false] %s3530_s4 }
  0x6d   : > { %s3532_s3 = scalar_lea.vmem %s3531_s4, 128  ;;  %p3533_p1 = scmp.lt.s32.totalorder %s751_s23, %s3531_s4 }
  0x6e   : > { %p3528_p0 = pnand %p3526_p12, %p4098_p8  ;;  %p3534_p11 = scmp.lt.s32.totalorder %s3532_s3, %s3525_s0 }
  0x70   : > { %p3529_p4 = pneg %p3528_p0  ;;  %p3535_p6 = por %p3534_p11, %p3533_p1 }
  0x72   : > { %p3536_p7 = pnand %p3535_p6, %p3529_p4 }
  0x74   : > { %3539 = shalt.err (!%p3536_p7)
}
  0x75   : > { %p4933_p9 = scmp.ne.s32.totalorder %s4919_s27, 0  ;;  %p4934_p2 = scmp.eq.s32.totalorder %s4130_s14, 0 }
  0x76   : > { %p4935_p10 = scmp.ne.s32.totalorder %s4931_s12, 0  ;;  %s2909_s4 = sshll.u32 %s3850_s5, 4 }
  0x77   : > { %3339 = dma.hbm_to_vmem [thread:$0]  (!%p4933_p9), %s4127_s26, 64, %s751_s23, %s4092_s16  }
  0x78   : > { %p4936_p3 = pneg %p4935_p10  ;;  %s768_s10 = scalar_lea.vmem [#allocation9], %s4067_s17 }
  0x79   : > { %s775_s25 = sshll.u32 %s768_s10, 4  ;;  %s4938_s11 = sld [smem:[#allocation57_spill]]  ;;  %s4228_s25 = int_to_ptr.vmem [resolvable:$true] %s775_s25 }
  0x7a   : > { %p4190_p5 = pnand %p4936_p3, %p4934_p2  ;;  %s4939_s26 = sld [smem:[#allocation49_spill]] }
  0x7c   : > { %s4937_s1 = scalar_select %p4190_p5, 1, 0 }
  0x7d   : > { %p4866_p1 = pneg %p4190_p5 }
  0x7f   : > { %s4199_s22 = scalar_lea.hbm %s4938_s11, %s2909_s4 }
  0x80   : > { %s3540_s23 = scalar_lea.hbm %s4939_s26, 64 }
  0x81   : > { %p3541_p6 = scmp.ne.s32.totalorder %s4939_s26, %s3540_s23  ;;  %p3547_p13 = scmp.lt.u32.totalorder %s3540_s23, %s4939_s26 }
  0x83   : > { %p3543_p11 = pnand %p4866_p1, %p3541_p6 }
  0x85   : > { %p3544_p12 = pneg %p3543_p11 }
  0x87   : > { %p3549_p0 = pnand %p3547_p13, %p3544_p12 }
  0x89   : > { %3552 = shalt.err (!%p3549_p0)
}
  0x8a   : > { %s3553_s8 = scalar_lea.vmem %s4163_s7, 64  ;;  %p3561_p3 = scmp.lt.s32.totalorder %s4163_s7, %s4163_s7 }
  0x8b   : > { %p3554_p4 = scmp.ne.s32.totalorder %s4163_s7, %s3553_s8  ;;  %p3562_p6 = scmp.lt.s32.totalorder %s3553_s8, %s3553_s8 }
  0x8d   : > { %p3556_p7 = pnand %p3554_p4, %p4866_p1  ;;  %p3563_p11 = por %p3562_p6, %p3561_p3 }
  0x8f   : > { %p3557_p2 = pneg %p3556_p7 }
  0x91   : > { %p3564_p10 = pnand %p3563_p11, %p3557_p2 }
  0x93   : > { %3567 = shalt.err (!%p3564_p10)
}
  0x94   : > { %3329 = dma.hbm_to_vmem [thread:$0]  (!%p4190_p5), %s4939_s26, 64, %s4163_s7, [#allocation4]  }
  0x95   : > { %s4940_s13 = sld [smem:[#allocation59_spill]]  ;;  %s766_s3 = scalar_lea.sflag [#allocation10], %s4064_s20 }
  0x96   : > { %s3568_s23 = scalar_lea.hbm %s4199_s22, 16  ;;  %s3573_s9 = scalar_lea.hbm %s4938_s11, 32 }
  0x97   : > { %p3569_p10 = scmp.ne.s32.totalorder %s4199_s22, %s3568_s23  ;;  %p3574_p0 = scmp.lt.u32.totalorder %s4199_s22, %s4938_s11 }
  0x98   : > { %p3575_p4 = scmp.lt.u32.totalorder %s3573_s9, %s3568_s23  ;;  %p3577_p2 = scmp.lt.u32.totalorder %s3568_s23, %s4199_s22 }
  0x99   : > { %p3571_p12 = pnand %p3569_p10, %p4098_p8 }
  0x9a   : > { %p3576_p7 = por %p3575_p4, %p3574_p0 }
  0x9b   : > { %s4233_s0 = scalar_lea.hbm %s4940_s13, %s2909_s4  ;;  %p3572_p13 = pneg %p3571_p12 }
  0x9c   : > { %p3578_p3 = por %p3577_p2, %p3576_p7 }
  0x9e   : > { %p3579_p6 = pnand %p3578_p3, %p3572_p13 }
  0xa0   : > { %3582 = shalt.err (!%p3579_p6)
}
  0xa1   : > { %s3583_s7 = scalar_lea.vmem %s4228_s25, 16  ;;  %s3863_s4 = smov [#allocation9]  }
  0xa2   : > { %p3584_p11 = scmp.ne.s32.totalorder %s4228_s25, %s3583_s7  ;;  %s3588_s12 = sshll.u32 %s3863_s4, 4  ;;  %s3589_s12 = int_to_ptr.vmem [resolvable:$false] %s3588_s12 }
  0xa3   : > { %s3590_s16 = scalar_lea.vmem %s3589_s12, 32  ;;  %p3591_p1 = scmp.lt.s32.totalorder %s4228_s25, %s3589_s12 }
  0xa4   : > { %p3586_p10 = pnand %p3584_p11, %p4098_p8  ;;  %p3592_p5 = scmp.lt.s32.totalorder %s3590_s16, %s3583_s7 }
  0xa6   : > { %p3587_p12 = pneg %p3586_p10  ;;  %p3593_p0 = por %p3592_p5, %p3591_p1 }
  0xa8   : > { %p3594_p4 = pnand %p3593_p0, %p3587_p12 }
  0xaa   : > { %3597 = shalt.err (!%p3594_p4)
}
  0xab   : > { %3342 = dma.hbm_to_vmem [thread:$0]  (!%p4933_p9), %s4199_s22, 16, %s4228_s25, %s766_s3  }
  0xac   : > { %s3864_s30 = smov [#allocation12]   ;;  %s793_s10 = scalar_lea.vmem [#allocation11], %s4067_s17 }
  0xad   : > { %s659_s23 = sshll.u32 %s3864_s30, 4  ;;  %s800_s8 = sshll.u32 %s793_s10, 4  ;;  %s660_s23 = int_to_ptr.vmem [resolvable:$true] %s659_s23  ;;  %s4260_s8 = int_to_ptr.vmem [resolvable:$true] %s800_s8 }
  0xae   : > { %s4941_s15 = sld [smem:[#allocation61_spill]]  ;;  %p4942_p1 = scmp.ne.s32.totalorder %s4937_s1, 0 }
  0xb0   : > { %p4943_p13 = pneg %p4942_p1 }
  0xb4   : > { %s3598_s7 = scalar_lea.hbm %s4941_s15, 16 }
  0xb5   : > { %p3599_p5 = scmp.ne.s32.totalorder %s4941_s15, %s3598_s7  ;;  %p3605_p3 = scmp.lt.u32.totalorder %s3598_s7, %s4941_s15 }
  0xb7   : > { %p3601_p7 = pnand %p3599_p5, %p4943_p13 }
  0xb9   : > { %p3602_p2 = pneg %p3601_p7 }
  0xbb   : > { %p3607_p6 = pnand %p3605_p3, %p3602_p2 }
  0xbd   : > { %3610 = shalt.err (!%p3607_p6)
}
  0xbe   : > { %s3611_s17 = scalar_lea.vmem %s660_s23, 16  ;;  %p4944_p10 = pmov %p4943_p13 }
  0xbf   : > { %p3612_p11 = scmp.ne.s32.totalorder %s660_s23, %s3611_s17  ;;  %s3618_s16 = scalar_lea.vmem %s660_s23, 32 }
  0xc0   : > { %p3619_p4 = scmp.lt.s32.totalorder %s660_s23, %s660_s23  ;;  %p3620_p9 = scmp.lt.s32.totalorder %s3618_s16, %s3611_s17 }
  0xc1   : > { %p3614_p12 = pnand %p3612_p11, %p4944_p10 }
  0xc2   : > { %p3621_p8 = por %p3620_p9, %p3619_p4 }
  0xc3   : > { %p3615_p0 = pneg %p3614_p12 }
  0xc5   : > { %p3622_p5 = pnand %p3621_p8, %p3615_p0 }
  0xc7   : > { %3625 = shalt.err (!%p3622_p5)
}
  0xc8   : > { %3332 = dma.hbm_to_vmem [thread:$0]  (!%p4942_p1), %s4941_s15, 16, %s660_s23, [#allocation13]  }
  0xc9   : > { %s3626_s9 = scalar_lea.hbm %s4233_s0, 16  ;;  %p4945_p7 = scmp.ne.s32.totalorder %s4921_s21, 0 }
  0xca   : > { %p3627_p13 = scmp.ne.s32.totalorder %s4233_s0, %s3626_s9  ;;  %s3631_s4 = scalar_lea.hbm %s4940_s13, 32 }
  0xcb   : > { %p3632_p8 = scmp.lt.u32.totalorder %s4233_s0, %s4940_s13  ;;  %p3633_p9 = scmp.lt.u32.totalorder %s3631_s4, %s3626_s9 }
  0xcc   : > { %p3629_p2 = pnand %p3627_p13, %p4945_p7  ;;  %p3635_p11 = scmp.lt.u32.totalorder %s3626_s9, %s4233_s0 }
  0xcd   : > { %p3634_p6 = por %p3633_p9, %p3632_p8 }
  0xce   : > { %p3630_p3 = pneg %p3629_p2 }
  0xcf   : > { %p3636_p10 = por %p3635_p11, %p3634_p6 }
  0xd1   : > { %p3637_p12 = pnand %p3636_p10, %p3630_p3 }
  0xd3   : > { %3640 = shalt.err (!%p3637_p12)
}
  0xd4   : > { %s3641_s23 = scalar_lea.vmem %s4260_s8, 16  ;;  %s3865_s25 = smov [#allocation11]  }
  0xd5   : > { %p3642_p1 = scmp.ne.s32.totalorder %s4260_s8, %s3641_s23  ;;  %s3646_s22 = sshll.u32 %s3865_s25, 4  ;;  %s3647_s22 = int_to_ptr.vmem [resolvable:$false] %s3646_s22 }
  0xd6   : > { %s3648_s17 = scalar_lea.vmem %s3647_s22, 32  ;;  %p3649_p5 = scmp.lt.s32.totalorder %s4260_s8, %s3647_s22 }
  0xd7   : > { %p3644_p0 = pnand %p3642_p1, %p4945_p7  ;;  %p3650_p13 = scmp.lt.s32.totalorder %s3648_s17, %s3641_s23 }
  0xd9   : > { %p3645_p4 = pneg %p3644_p0  ;;  %p3651_p2 = por %p3650_p13, %p3649_p5 }
  0xdb   : > { %p3652_p8 = pnand %p3651_p2, %p3645_p4 }
  0xdd   : > { %3655 = shalt.err (!%p3652_p8)
}
  0xde   : > { %p4946_p3 = scmp.ne.s32.totalorder %s4919_s27, 0  ;;  %s56_s21 = sadd.s32 1, %s3854_s24 }
  0xdf   : > { %s501_s27 = sadd.s32 1, %s3826_s29  ;;  %p4947_p7 = scmp.ne.s32.totalorder %s4915_s2, 0 }
  0xe0   : > { %3345 = dma.hbm_to_vmem [thread:$0]  (!%p4946_p3), %s4233_s0, 16, %s4260_s8, %s766_s3  }
  0xe1   : > { %s5017_s21 = smov (!%p4947_p7, %s56_s21), %s3854_s24  ;;  %p508_p9 = scmp.ne.s32.totalorder %s3826_s29, %s3822_s28 }
  0xe2   : > { %p58_p6 = scmp.ge.s32.totalorder %s5017_s21, 2  ;;  %s809_s16 = sand.u32 1, %s3826_s29  }
  0xe3   : > { %p4948_p11 = scmp.eq.s32.totalorder %s3858_s6, 0  ;;  %p4949_p12 = scmp.eq.s32.totalorder %s4130_s14, 3 }
  0xe4   : > { %s5019_s21 = smov (%p58_p6, %s5017_s21), 0  ;;  %s4323_s0 = sshll.u32 %s809_s16, 3 }
  0xe5   : > { %p510_p10 = por %p508_p9, %p4948_p11  ;;  %p4317_p1 = por %p4949_p12, %p508_p9 }
  0xe6   : > { %4952 = sst [smem:[#allocation42_spill]] %s5019_s21  ;;  %s2912_s2 = sshll.u32 %s3854_s24, 7 }
  0xe7   : > { %s4950_s30 = scalar_select %p4317_p1, 1, 0 }
  0xe8   : > { %s498_s3 = ssub.s32 %s3854_s24, %s5019_s21  ;;  %s4953_s18 = sld [smem:[#allocation64_spill]] }
  0xe9   : > { %4951 = sst [smem:[#allocation41_spill]] %s4950_s30  ;;  %p499_p0 = scmp.eq.s32.totalorder %s498_s3, 0 }
  0xea   : > { %s811_s5 = scalar_lea.vmem [#allocation14], %s4323_s0  ;;  %p4954_p4 = scmp.lt.s32.totalorder %s3858_s6, 4 }
  0xeb   : > { %s818_s7 = sshll.u32 %s811_s5, 4  ;;  %s808_s1 = scalar_lea.sflag [#allocation4], %s4064_s20  ;;  %s4345_s7 = int_to_ptr.vmem [resolvable:$true] %s818_s7 }
  0xec   : > { %p4338_p5 = pnand %p4954_p4, %p510_p10 }
  0xed   : > { %s4343_s12 = scalar_select %p499_p0, %s3826_s29, %s501_s27  }
  0xee   : > { %s4333_s9 = scalar_lea.hbm %s4953_s18, %s2912_s2  ;;  %p3658_p2 = pneg %p4338_p5 }
  0xef   : > { %4956 = sst [smem:[#allocation43_spill]] %s4343_s12  ;;  %s3656_s23 = scalar_lea.hbm %s4333_s9, 128 }
  0xf0   : > { %p3657_p13 = scmp.ne.s32.totalorder %s4333_s9, %s3656_s23  ;;  %s3661_s17 = scalar_lea.hbm %s4953_s18, 256 }
  0xf1   : > { %p3662_p7 = scmp.lt.u32.totalorder %s4333_s9, %s4953_s18  ;;  %p3663_p9 = scmp.lt.u32.totalorder %s3661_s17, %s3656_s23 }
  0xf2   : > { %p3659_p8 = pnand %p3658_p2, %p3657_p13  ;;  %p3665_p11 = scmp.lt.u32.totalorder %s3656_s23, %s4333_s9 }
  0xf3   : > { %p3664_p6 = por %p3663_p9, %p3662_p7 }
  0xf4   : > { %p3660_p3 = pneg %p3659_p8 }
  0xf5   : > { %p3666_p10 = por %p3665_p11, %p3664_p6 }
  0xf7   : > { %p3667_p12 = pnand %p3666_p10, %p3660_p3 }
  0xf9   : > { %3670 = shalt.err (!%p3667_p12)
}
  0xfa   : > { %s3671_s20 = scalar_lea.vmem %s4345_s7, 128  ;;  %s3866_s27 = smov [#allocation14]  }
  0xfb   : > { %p3672_p0 = scmp.ne.s32.totalorder %s4345_s7, %s3671_s20  ;;  %s3676_s8 = sshll.u32 %s3866_s27, 4  ;;  %s3677_s8 = int_to_ptr.vmem [resolvable:$false] %s3676_s8 }
  0xfc   : > { %s3678_s10 = scalar_lea.vmem %s3677_s8, 256  ;;  %p3679_p8 = scmp.lt.s32.totalorder %s4345_s7, %s3677_s8 }
  0xfd   : > { %p3674_p4 = pnand %p3672_p0, %p3658_p2  ;;  %p3680_p7 = scmp.lt.s32.totalorder %s3678_s10, %s3671_s20 }
  0xff   : > { %p3675_p13 = pneg %p3674_p4  ;;  %p3681_p9 = por %p3680_p7, %p3679_p8 }
 0x101   : > { %p3682_p6 = pnand %p3681_p9, %p3675_p13 }
 0x103   : > { %3685 = shalt.err (!%p3682_p6)
}
 0x104   : > { %3348 = dma.hbm_to_vmem [thread:$0]  (!%p4338_p5), %s4333_s9, 128, %s4345_s7, %s808_s1  }
 0x105   : > { %s4957_s19 = sld [smem:[#allocation65_spill]]  ;;  %s829_s22 = scalar_lea.vmem [#allocation15], %s4323_s0 }
 0x106   : > { %s836_s17 = sshll.u32 %s829_s22, 4  ;;  %s837_s17 = int_to_ptr.vmem [resolvable:$true] %s836_s17 }
 0x10b   : > { %s4378_s25 = scalar_lea.hbm %s4957_s19, %s2912_s2  ;;  %s3691_s1 = scalar_lea.hbm %s4957_s19, 256 }
 0x10c   : > { %s3686_s16 = scalar_lea.hbm %s4378_s25, 128  ;;  %p3692_p12 = scmp.lt.u32.totalorder %s4378_s25, %s4957_s19 }
 0x10d   : > { %p3687_p3 = scmp.ne.s32.totalorder %s4378_s25, %s3686_s16  ;;  %p3693_p0 = scmp.lt.u32.totalorder %s3691_s1, %s3686_s16 }
 0x10e   : > { %p3695_p13 = scmp.lt.u32.totalorder %s3686_s16, %s4378_s25 }
 0x10f   : > { %p3689_p11 = pnand %p3687_p3, %p3658_p2  ;;  %p3694_p4 = por %p3693_p0, %p3692_p12 }
 0x111   : > { %p3690_p10 = pneg %p3689_p11  ;;  %p3696_p8 = por %p3695_p13, %p3694_p4 }
 0x113   : > { %p3697_p7 = pnand %p3696_p8, %p3690_p10 }
 0x115   : > { %3700 = shalt.err (!%p3697_p7)
}
 0x116   : > { %s3701_s0 = scalar_lea.vmem %s837_s17, 128  ;;  %s3867_s20 = smov [#allocation15]  }
 0x117   : > { %p3702_p9 = scmp.ne.s32.totalorder %s837_s17, %s3701_s0  ;;  %s3706_s27 = sshll.u32 %s3867_s20, 4  ;;  %s3707_s27 = int_to_ptr.vmem [resolvable:$false] %s3706_s27 }
 0x118   : > { %s3708_s8 = scalar_lea.vmem %s3707_s27, 256  ;;  %p3709_p11 = scmp.lt.s32.totalorder %s837_s17, %s3707_s27 }
 0x119   : > { %p3704_p6 = pnand %p3702_p9, %p3658_p2  ;;  %p3710_p1 = scmp.lt.s32.totalorder %s3708_s8, %s3701_s0 }
 0x11b   : > { %p3705_p3 = pneg %p3704_p6  ;;  %p3711_p0 = por %p3710_p1, %p3709_p11 }
 0x11d   : > { %p3712_p12 = pnand %p3711_p0, %p3705_p3 }
 0x11f   : > { %3715 = shalt.err (!%p3712_p12)
}
 0x120   : > { %s4958_s10 = sld [smem:[#allocation36_spill]]  ;;  %s4959_s5 = sld [smem:[#allocation40_spill]] }
 0x126   : > { %3351 = dma.hbm_to_vmem [thread:$0]  (!%p4338_p5), %s4378_s25, 128, %s837_s17, %s4958_s10  }
 0x127   : > { %p4960_p10 = scmp.ne.s32.totalorder %s4959_s5, 0 }
 0x129   : > { %845 = sbr.rel (%p4960_p10) target bundleno = 4504 (0x1198), region = 100 }
 0x130   : > { %p4961_p2 = scmp.eq.s32.totalorder %s4130_s14, 0 }
 0x132   : > { %3789 = dma.done.wait (%p4961_p2), [#allocation4], 64   ;;  %p4962_p4 = pmov %p4961_p2 }
 0x133   : > { %s4963_s23 = sld [smem:[#allocation27_spill]]  ;;  %s4964_s22 = sld [smem:[#allocation37_spill]] }
 0x134   : > { %3791 = vsyncadd (%p4962_p4), [#allocation4], 4294967232  ;;  %s851_s16 = sand.u32 1, %s4130_s14  }
 0x135   : > { %s852_s7 = scalar_lea.sflag [#allocation7], %s851_s16 }
 0x139   : > { %s4409_s9 = sand.u32 1, %s4963_s23   ;;  %p4965_p1 = scmp.ne.s32.totalorder %s4964_s22, 0 }
 0x13a   : > { %s2917_s4 = sshll.u32 %s4409_s9, 2 }
 0x13b   : > { %s4412_s1 = scalar_lea.vmem [#allocation6], %s2917_s4 }
 0x13c   : > { %3793 = dma.done.wait (%p4965_p1), %s852_s7, 128  }
 0x13d   : > { %3795 = vsyncadd (%p4965_p1), %s852_s7, 4294967168  ;;  %s4418_s25 = scalar_lea.vmem [#allocation8], %s2917_s4  ;;  %s870_s17 = scalar_lea.sflag [#allocation10], %s851_s16 }
 0x13e   : > { %3797 = dma.done.wait (%p4965_p1), %s870_s17, 32  }
 0x13f   : > { %3799 = vsyncadd (%p4965_p1), %s870_s17, 4294967264  ;;  %p4966_p5 = pmov %p4961_p2 }
 0x140   : > { %p4967_p13 = pmov %p4961_p2 }
 0x141   : > { %3801 = dma.done.wait (%p4966_p5), [#allocation13], 16  }
 0x142   : > { %3803 = vsyncadd (%p4967_p13), [#allocation13], 4294967280  ;;  %s4968_s0 = sld [smem:[#allocation38_spill]]  ;;  %s4431_s20 = sand.u32 1, %s3822_s28  }
 0x143   : > { %s2920_s27 = sshll.u32 %s4431_s20, 3  ;;  %s890_s8 = scalar_lea.sflag [#allocation4], %s851_s16 }
 0x144   : > { %s4434_s10 = scalar_lea.vmem [#allocation14], %s2920_s27 }
 0x145   : > { %4969 = sst [smem:[#allocation44_spill]] %s4434_s10 }
 0x148   : > { %p4970_p8 = scmp.ne.s32.totalorder %s4968_s0, 0 }
 0x14a   : > { %3805 = dma.done.wait (%p4970_p8), %s890_s8, 128  }
 0x14b   : > { %3807 = vsyncadd (%p4970_p8), %s890_s8, 4294967168  ;;  %s4440_s5 = scalar_lea.vmem [#allocation15], %s2920_s27 }
 0x14c   : > { %4971 = sst [smem:[#allocation45_spill]] %s4440_s5 }
 0x14d   : > { %3809 = dma.done.wait (%p4970_p8), %s852_s7, 128  }
 0x14e   : > { %3811 = vsyncadd (%p4970_p8), %s852_s7, 4294967168  ;;  %s4972_s14 = sld [smem:[#allocation30_spill]]  ;;  %s4973_s23 = sld [smem:[#allocation29_spill]] }
 0x14f   : > { %s4974_s27 = sld [smem:[#allocation46_spill]]  ;;  %s4975_s13 = sld [smem:[#allocation47_spill]] }
 0x150   : > { %s4976_s26 = sld [smem:[#allocation50_spill]]  ;;  %s4977_s29 = sld [smem:[#allocation51_spill]] }
 0x151   : > { %s4979_s3 = sld [smem:[#allocation54_spill]]  ;;  %s4981_s12 = sld [smem:[#allocation58_spill]] }
 0x154   : > { %p1032_p7 = scmp.lt.s32.totalorder %s4972_s14, 1  ;;  %p1041_p9 = scmp.lt.s32.totalorder %s4973_s23, 1 }
 0x155   : > { %p2939_p6 = scmp.ne.s32.totalorder %s4973_s23, 0 }
 0x156   : > { %s5021_s14 = smov (!%p1032_p7, %s4972_s14), 1  ;;  %vm1084_vm0 = vcmask (!%p2939_p6), 261120  }
 0x157   : > { %s1042_s22 = scalar_select %p1041_p9, %s4973_s23, 1 }
 0x158   : > { %s2922_s16 = sshll.u32 %s5021_s14, 3  ;;  %s2969_s4 = sshll.u32 %s5021_s14, 4 }
 0x159   : > { %s1035_s2 = scalar_lea.vmem %s4974_s27, %s2922_s16  ;;  %s4456_s0 = scalar_lea.vmem %s4975_s13, %s2969_s4 }
 0x15a   : > { %s2925_s7 = sshll.u32 %s1042_s22, 2  ;;  %s2970_s15 = sshll.u32 %s1042_s22, 7  ;;  %v1083_v0 = vld [vmem:[%s1035_s2] sm:$0xff] (!%p2939_p6) }
 0x15b   : > { %s4461_s21 = scalar_lea.vmem %s4976_s26, %s2925_s7  ;;  %s4466_s14 = scalar_lea.vmem %s4977_s29, %s2925_s7  ;;  %1085 = vst.msk [vmem:[#allocation2] sm:$0xff] (!%p2939_p6), %vm1084_vm0, %v1083_v0 }
 0x15c   : > { %s4978_s16 = sld [smem:[#allocation52_spill]]  ;;  %s4476_s27 = scalar_lea.vmem %s4979_s3, %s2970_s15 }
 0x15d   : > { %s2972_s6 = sshll.u32 %s1042_s22, 5  ;;  %s2973_s30 = sshll.u32 %s1042_s22, 6 }
 0x15e   : > { %s4980_s26 = sld [smem:[#allocation56_spill]]  ;;  %s4486_s7 = scalar_lea.vmem %s4981_s12, %s2973_s30 }
 0x15f   : > { %s4983_s13 = sld [smem:[#allocation68_spill]]  ;;  %s1017_s22 = scalar_lea.vmem [#allocation16], %s4431_s20 }
 0x162   : > { %s4471_s8 = scalar_lea.vmem %s4978_s16, %s2970_s15  ;;  %s4982_s16 = sld [smem:[#allocation67_spill]] }
 0x163   : > { %1082 = sbr.rel (%p2939_p6) target bundleno = 362 (0x16a), region = 136 }
 0x164   : > { %s4481_s5 = scalar_lea.vmem %s4980_s26, %s2972_s6 }
 0x165   : > { %s4496_s3 = scalar_lea.vmem %s4983_s13, %s2969_s4 }
 0x168   : > { %s4491_s10 = scalar_lea.vmem %s4982_s16, %s2969_s4 }
 0x16a PF: > { %v4502_v1 = vld [vmem:[#allocation2] sm:$0xff]  ;;  %vm1130_vm1 = vcmask 261120   ;;  %v1105_v9 = vld [vmem:[%s4471_s8 + $0x48] sm:$0xff]  ;;  %v3868_v11 = vmov 0.0|0.0   ;;  %v1106_v14 = vld [vmem:[%s4471_s8 + $0x50] sm:$0xff]  ;;  %vm3869_vm2 = vmmov 0   ;;  %v1145_v24 = vlaneseq }
 0x16b   : > { %v1131_v2 = vsel %vm1130_vm1, %v4502_v1, 0.0  ;;  %v1104_v8 = vld [vmem:[%s4471_s8 + $0x40] sm:$0xff]  ;;  %3226 = vmatprep.subr.bf16.mxu0 %v3868_v11  ;;  %3214 = vmatprep.subr.bf16.mxu1 %v3868_v11  ;;  %v1097_v13 = vld [vmem:[%s4471_s8 + $0x8] sm:$0xff]  ;;  %v1107_v15 = vld [vmem:[%s4471_s8 + $0x58] sm:$0xff]  ;;  %v3870_v19 = vmov 0.0   ;;  %s4984_s30 = sld [smem:[#allocation48_spill]] }
 0x16c   : > { %1132 = vadd.xlane.f32.xlu0 %v1131_v2  ;;  %v1096_v10 = vld [vmem:[%s4471_s8] sm:$0xff]  ;;  %v3227_v12 = vpack.c.bf16 %v1105_v9, %v1104_v8  ;;  %v1098_v17 = vld [vmem:[%s4471_s8 + $0x10] sm:$0xff]  ;;  %v1099_v18 = vld [vmem:[%s4471_s8 + $0x18] sm:$0xff]  ;;  %3083 = vmatprep.mubr.msk.f32.mxu0 %vm3869_vm2, %v3870_v19  ;;  %v3230_v20 = vpack.c.bf16 %v1107_v15, %v1106_v14  ;;  %v4526_v26 = vshrl.u32 %v1145_v24, 7  ;;  %vm1481_vm3 = vcmask 1043456  }
 0x16d   : > { %v3215_v16 = vpack.c.bf16 %v1097_v13, %v1096_v10  ;;  %3061 = vmatprep.mubr.msk.f32.mxu1 %vm3869_vm2, %v3870_v19  ;;  %v3218_v21 = vpack.c.bf16 %v1099_v18, %v1098_v17  ;;  %v4532_v28 = vld [vmem:[%s4461_s21] sm:$0x7]  ;;  %v1101_v36 = vld [vmem:[%s4471_s8 + $0x28] sm:$0xff]  ;;  %v1102_v40 = vld [vmem:[%s4471_s8 + $0x30] sm:$0xff]  ;;  %vm1458_vm4 = vcmask 31744   ;;  %vm1643_vm5 = vcmask 261127  }
 0x16e   : > { %3228 = vmatpush3.bf16.msra.mxu0 %v3227_v12  ;;  %v4529_v27 = vsub.s32 0, %v4526_v26  ;;  %v4535_v29 = vld [vmem:[%s4466_s14] sm:$0x7]  ;;  %v1103_v41 = vld [vmem:[%s4471_s8 + $0x38] sm:$0xff]  ;;  %v1231_v53 = vsub.s32 1, %v4526_v26  ;;  %vm1993_vm6 = vcmask 27648  }
 0x16f   : > { %3216 = vmatpush3.bf16.msra.mxu1 %v3215_v16  ;;  %3229 = vmatprep.subr.bf16.mxu0 %v3868_v11  ;;  %v1100_v35 = vld [vmem:[%s4471_s8 + $0x20] sm:$0xff]  ;;  %v3224_v42 = vpack.c.bf16 %v1103_v41, %v1102_v40  ;;  %v4578_v54 = vld [vmem:[%s4412_s1] sm:$0xf]  ;;  %v4588_v62 = vld [vmem:[#allocation3] sm:$0xf]  ;;  %vm2104_vm7 = vcmask 257024  }
 0x170   : > { %3217 = vmatprep.subr.bf16.mxu1 %v3868_v11  ;;  %v1148_v30 = vrot.slane %v4532_v28, %v4529_v27  ;;  %v1153_v33 = vrot.slane %v4535_v29, %v4529_v27  ;;  %v3221_v38 = vpack.c.bf16 %v1101_v36, %v1100_v35  ;;  %v1232_v56 = vrot.slane %v4578_v54, %v1231_v53  ;;  %v1108_v24 = vld [vmem:[%s4471_s8 + $0x60] sm:$0xff]  ;;  %s4986_s1 = scalar_lea.vmem [#allocation9], %s4409_s9 }
 0x171   : > { %s4985_s2 = smov %s4984_s30  ;;  %v1089_v43 = vld [vmem:[%s4984_s30] sm:$0xff]  ;;  %vm2300_vm8 = vcmask 523264   ;;  %vm2392_vm9 = vcmask (!%p2939_p6), 261121  }
 0x172   : > { %3231 = vmatpush3.bf16.msra.mxu0 %v3230_v20  ;;  %v1090_v44 = vld [vmem:[%s4985_s2 + $0x8] sm:$0xff]  ;;  %v1091_v46 = vld [vmem:[%s4985_s2 + $0x10] sm:$0xff]  ;;  %v1092_v47 = vld [vmem:[%s4985_s2 + $0x18] sm:$0xff] }
 0x173   : > { %3219 = vmatpush3.bf16.msra.mxu1 %v3218_v21  ;;  %3097 = vmatprep.subr.mxu0 %v3870_v19  ;;  %v4562_v45 = vpack.c.bf16 %v1090_v44, %v1089_v43  ;;  %v4572_v48 = vpack.c.bf16 %v1092_v47, %v1091_v46 }
 0x174   : > { %3220 = vmatprep.subr.bf16.mxu1 %v3868_v11 }
 0x1f9   : > { %v1133_v3 = vpop.xlane.xlu0 %1132 }
 0x1fa   : > { %v1135_v4 = vmul.f32 0.03125, %v1133_v3 }
 0x1fc   : > { %v1136_v5 = vsub.f32 %v4502_v1, %v1135_v4 }
 0x1fe   : > { %v1137_v6 = vmul.f32 %v1136_v5, %v1136_v5 }
 0x200   : > { %v1138_v7 = vsel %vm1130_vm1, %v1137_v6, 0.0 }
 0x201   : > { %1139 = vadd.xlane.f32.xlu0 %v1138_v7 }
 0x28e   : > { %v1140_v22 = vpop.xlane.xlu0 %1139 }
 0x28f   : > { %v1141_v23 = vmul.f32 0.03125, %v1140_v22 }
 0x291   : > { %v1142_v25 = vadd.f32 1e-12, %v1141_v23 }
 0x293   : > { %3458 = vrsqrt.f32 %v1142_v25  ;;  %v1109_v25 = vld [vmem:[%s4471_s8 + $0x68] sm:$0xff] }
 0x29d   : > { %v3459_v31 = vpop.eup %3458 }
 0x29e   : > { %v1144_v32 = vmul.f32 %v3459_v31, %v1136_v5  ;;  %v1110_v31 = vld [vmem:[%s4471_s8 + $0x70] sm:$0xff] }
 0x2a0   : > { %v1149_v34 = vmul.f32 %v1148_v30, %v1144_v32  ;;  %v3239_v30 = vpack.c.bf16 %v1109_v25, %v1108_v24  ;;  %v1111_v32 = vld [vmem:[%s4471_s8 + $0x78] sm:$0xff] }
 0x2a1   : > { %v4640_v25 = vld [vmem:[%s4418_s25] sm:$0xf]  ;;  %s4987_s25 = scalar_lea.vmem [#allocation11], %s4409_s9 }
 0x2a2   : > { %v1154_v37 = vadd.f32 %v1153_v33, %v1149_v34  ;;  %v3242_v33 = vpack.c.bf16 %v1111_v32, %v1110_v31  ;;  %v1307_v34 = vsub.s32 2, %v4526_v26  ;;  %v2114_v26 = vrot.slane %v4640_v25, 3 }
 0x2a4   : > { %3084 = vmatmul.mubr.msk.f32.vlgmr.msra.gmra.mrb[0].mxu0 %vm1130_vm1, %v1154_v37  ;;  %v1156_v39 = vrot.slane %v1154_v37, 7  ;;  %v1308_v35 = vrot.slane %v4578_v54, %v1307_v34 }
 0x2a5   : > { %3099 = vmatprep.mubr.msk.f32.mxu0 %vm3869_vm2, %v3870_v19  ;;  %3098 = vmatpush3.msk.msra.mxu0 %vm1481_vm3, %v4588_v62 }
 0x2a6   : > { %3062 = vmatmul.mubr.msk.f32.vlgmr.msra.gmra.mrb[0].mxu1 %vm1130_vm1, %v1156_v39  ;;  %3244 = vmatprep.subr.bf16.mxu0 %v3868_v11 }
 0x2a7   : > { %3222 = vmatpush3.bf16.msra.mxu1 %v3221_v38  ;;  %3072 = vmatprep.mubr.msk.f32.mxu1 %vm3869_vm2, %v3870_v19 }
 0x2a8   : > { %3223 = vmatprep.subr.bf16.mxu1 %v3868_v11 }
 0x2ab   : > { %3225 = vmatpush3.bf16.msra.mxu1 %v3224_v42 }
 0x2ac   : > { %3232 = vmatprep.subr.bf16.mxu1 %v3868_v11 }
 0x2ae   : > { %3073 = vmatmul.mubr.msk.f32.vlgmr.msra.gmra.mrb[2].mxu1 %vm1130_vm1, %v1154_v37 }
 0x2af   : > { %3094 = vmatprep.mubr.msk.f32.mxu1 %vm3869_vm2, %v3870_v19  ;;  %3234 = vmatpush3.bf16.msra.mxu1 %v4562_v45 }
 0x2b0   : > { %3235 = vmatprep.subr.bf16.mxu1 %v3868_v11 }
 0x2b3   : > { %3237 = vmatpush3.bf16.msra.mxu1 %v4572_v48 }
 0x2b4   : > { %3238 = vmatprep.subr.bf16.mxu1 %v3868_v11 }
 0x377   : > { %v1375_v49 = vpop.f32.mrb[0].mxu0 }
 0x378   : > { %v3085_v50 = vpop.f32.mrb[1].mxu0  ;;  %v1376_v36 = vadd.f32 %v1375_v49, %v1308_v35 }
 0x379   : > { %v1225_v51 = vpop.f32.mrb[0].mxu1  ;;  %v1564_v50 = vrot.slane %v4578_v54, 3 }
 0x37a   : > { %v3063_v52 = vpop.f32.mrb[1].mxu1  ;;  %v1226_v55 = vadd.f32 %v1225_v51, %v4578_v54 }
 0x37c   : > { %v1382_v58 = vrot.slane %v1226_v55, %v4529_v27 }
 0x381   : > { %v1301_v57 = vpop.f32.mrb[2].mxu1 }
 0x382   : > { %v1302_v59 = vadd.f32 %v1301_v57, %v1232_v56  ;;  %v3074_v60 = vpop.f32.mrb[3].mxu1 }
 0x384   : > { %v1383_v61 = vmul.f32 %v1382_v58, %v1302_v59 }
 0x386   : > { %3095 = vmatmul.mubr.msk.f32.vlgmr.msra.gmra.mrb[4].mxu1 %vm1130_vm1, %v1383_v61 }
 0x387   : > { %3110 = vmatprep.mubr.msk.f32.mxu1 %vm3869_vm2, %v3870_v19  ;;  %3240 = vmatpush3.bf16.msra.mxu1 %v3239_v30  ;;  %v1742_v30 = vrot.slane %v4640_v25, %v1231_v53  ;;  %v1122_v53 = vld [vmem:[%s4476_s27 + $0x48] sm:$0xff] }
 0x388   : > { %3241 = vmatprep.subr.bf16.mxu1 %v3868_v11 }
 0x38b   : > { %3243 = vmatpush3.bf16.msra.mxu1 %v3242_v33 }
 0x459   : > { %v1453_v63 = vpop.f32.mrb[4].mxu1 }
 0x45a   : > { %v1457_v0 = vmul.f32 0.35355338, %v1453_v63  ;;  %v3096_v2 = vpop.f32.mrb[5].mxu1  ;;  %v1117_v63 = vld [vmem:[%s4476_s27 + $0x20] sm:$0xff] }
 0x45b   : > { %v1113_v2 = vld [vmem:[%s4476_s27] sm:$0xff] }
 0x45c   : > { %v1459_v3 = vsel %vm1458_vm4, %v1457_v0, -inf }
 0x45d   : > { %v1460_v4 = vrot.slane %v1459_v3, 4 }
 0x45f   : > { %v1461_v5 = vmax.f32 %v1459_v3, %v1460_v4  ;;  %v1114_v3 = vld [vmem:[%s4476_s27 + $0x8] sm:$0xff] }
 0x460   : > { %v3245_v4 = vpack.c.bf16 %v1114_v3, %v1113_v2 }
 0x461   : > { %v1462_v6 = vrot.slane %v1461_v5, 2 }
 0x463   : > { %v1463_v7 = vmax.f32 %v1461_v5, %v1462_v6  ;;  %v1119_v5 = vld [vmem:[%s4476_s27 + $0x30] sm:$0xff]  ;;  %v1120_v6 = vld [vmem:[%s4476_s27 + $0x38] sm:$0xff] }
 0x465   : > { %v1464_v8 = vrot.slane %v1463_v7, 1 }
 0x467   : > { %v1465_v9 = vmax.f32 %v1463_v7, %v1464_v8  ;;  %v1115_v7 = vld [vmem:[%s4476_s27 + $0x10] sm:$0xff]  ;;  %v3254_v8 = vpack.c.bf16 %v1120_v6, %v1119_v5 }
 0x469   : > { %v1466_v10 = vsub.f32 %v1457_v0, %v1465_v9  ;;  %v1116_v9 = vld [vmem:[%s4476_s27 + $0x18] sm:$0xff] }
 0x46b   : > { %v1467_v12 = vmul.f32 1.442695, %v1466_v10  ;;  %v1087_v10 = vld [vmem:[%s4456_s0] sm:$0xff] }
 0x46d   : > { %3460 = vpow2.f32 %v1467_v12  ;;  %v3248_v12 = vpack.c.bf16 %v1116_v9, %v1115_v7 }
 0x477   : > { %v3461_v13 = vpop.eup %3460 }
 0x478   : > { %v1469_v14 = vsel %vm1458_vm4, %v3461_v13, 0.0 }
 0x479   : > { %v1470_v15 = vrot.slane %v1469_v14, 4 }
 0x47b   : > { %v1471_v16 = vadd.f32 %v1470_v15, %v1469_v14 }
 0x47d   : > { %v1472_v17 = vrot.slane %v1471_v16, 2 }
 0x47f   : > { %v1473_v18 = vadd.f32 %v1472_v17, %v1471_v16  ;;  %v1658_v17 = vrot.slane %v4532_v28, 2 }
 0x481   : > { %v1474_v20 = vrot.slane %v1473_v18, 1 }
 0x483   : > { %v1475_v21 = vadd.f32 %v1474_v20, %v1473_v18  ;;  %v1662_v20 = vrot.slane %v4535_v29, 2 }
 0x485   : > { %3462 = vrcp.f32 %v1475_v21 }
 0x48f   : > { %v3463_v22 = vpop.eup %3462 }
 0x490   : > { %v1477_v23 = vmul.f32 %v3463_v22, %v3461_v13  ;;  %v1088_v13 = vld [vmem:[%s4456_s0 + $0x8] sm:$0xf]  ;;  %s4989_s0 = sld [smem:[#allocation44_spill]] (!%p2939_p6) }
 0x492   : > { %3100 = vmatmul.mubr.msk.f32.vlgmr.msra.gmra.mrb[2].mxu0 %vm1458_vm4, %v1477_v23 }
 0x493   : > { %3121 = vmatprep.mubr.msk.f32.mxu0 %vm3869_vm2, %v3870_v19  ;;  %3246 = vmatpush3.bf16.msra.mxu0 %v3245_v4 }
 0x494   : > { %3247 = vmatprep.subr.bf16.mxu0 %v3868_v11 }
 0x497   : > { %3249 = vmatpush3.bf16.msra.mxu0 %v3248_v12 }
 0x565   : > { %v1551_v37 = vpop.f32.mrb[2].mxu0 }
 0x566   : > { %v1555_v38 = vmul.f32 %v1551_v37, %v1376_v36  ;;  %v3101_v39 = vpop.f32.mrb[3].mxu0 }
 0x568   : > { %v1556_v40 = vsel %vm1130_vm1, %v1555_v38, 0.0 }
 0x569   : > { %v1557_v41 = vrot.slane %v1556_v40, 4 }
 0x56b   : > { %v1558_v42 = vadd.f32 %v1557_v41, %v1556_v40  ;;  %v1121_v40 = vld [vmem:[%s4476_s27 + $0x40] sm:$0xff]  ;;  %v1123_v41 = vld [vmem:[%s4476_s27 + $0x50] sm:$0xff] }
 0x56d   : > { %v1559_v43 = vrot.slane %v1558_v42, 2 }
 0x56f   : > { %v1560_v44 = vadd.f32 %v1559_v43, %v1558_v42  ;;  %v3258_v42 = vpack.c.bf16 %v1122_v53, %v1121_v40  ;;  %v1124_v43 = vld [vmem:[%s4476_s27 + $0x58] sm:$0xff] }
 0x571   : > { %v1561_v46 = vrot.slane %v1560_v44, 1  ;;  %3259 = vmatprep.subr.bf16.mxu0 %v3258_v42 }
 0x573   : > { %v1562_v47 = vadd.f32 %v1561_v46, %v1560_v44  ;;  %v3262_v44 = vpack.c.bf16 %v1124_v43, %v1123_v41 }
 0x575   : > { %3111 = vmatmul.mubr.msk.f32.vlgmr.msra.gmra.mrb[6].mxu1 %vm1130_vm1, %v1562_v47 }
 0x576   : > { %3132 = vmatprep.mubr.msk.f32.mxu1 %vm1130_vm1, %v1087_v10 }
 0x648   : > { %v1635_v51 = vpop.f32.mrb[6].mxu1 }
 0x649   : > { %v1636_v52 = vadd.f32 %v1635_v51, %v1564_v50  ;;  %v3112_v49 = vpop.f32.mrb[7].mxu1 }
 0x64b   : > { %v1640_v55 = vrot.slane %v1636_v52, 1 }
 0x64d   : > { %v4611_v56 = vadd.f32 %v1640_v55, %v4502_v1  ;;  %v1118_v1 = vld [vmem:[%s4476_s27 + $0x28] sm:$0xff] }
 0x64e   : > { %v3250_v0 = vpack.c.bf16 %v1118_v1, %v1117_v63 }
 0x64f   : > { %v1644_v57 = vsel %vm1643_vm5, %v4611_v56, 0.0 }
 0x650   : > { %1645 = vadd.xlane.f32.xlu1 %v1644_v57  ;;  %3251 = vmatprep.subr.bf16.mxu1 %v3250_v0 }
 0x651   : > { %3253 = vmatpush3.bf16.msra.mxu1 %v3250_v0 }
 0x652   : > { %3255 = vmatprep.subr.bf16.mxu1 %v3254_v8 }
 0x655   : > { %3257 = vmatpush3.bf16.msra.mxu1 %v3254_v8 }
 0x656   : > { %3267 = vmatprep.subr.bf16.mxu1 %v4562_v45 }
 0x658   : > { %3133 = vmatmul.mubr.msk.f32.vlgmr.msra.gmra.mrb[8].mxu1 %vm1130_vm1, %v1088_v13 }
 0x659   : > { %3269 = vmatpush3.bf16.msra.mxu1 %v4562_v45 }
 0x65a   : > { %3271 = vmatprep.subr.bf16.mxu1 %v4572_v48 }
 0x65d   : > { %3273 = vmatpush3.bf16.msra.mxu1 %v4572_v48 }
 0x65e   : > { %3280 = vmatprep.subr.bf16.mxu1 %v3868_v11 }
 0x6dd   : > { %v1646_v58 = vpop.xlane.xlu1 %1645 }
 0x6de   : > { %v1647_v54 = vmul.f32 0.03125, %v1646_v58 }
 0x6e0   : > { %v1648_v59 = vsub.f32 %v4611_v56, %v1647_v54 }
 0x6e2   : > { %v1649_v60 = vmul.f32 %v1648_v59, %v1648_v59 }
 0x6e4   : > { %v1650_v61 = vsel %vm1643_vm5, %v1649_v60, 0.0 }
 0x6e5   : > { %1651 = vadd.xlane.f32.xlu1 %v1650_v61 }
 0x72b   : > { %v3134_v48 = vpop.f32.mrb[8].mxu1 }
 0x72c   : > { %v1815_v24 = vpop.f32.mrb[9].mxu1  ;;  %v1821_v33 = vadd.f32 %v3134_v48, %v1742_v30  ;;  %v1827_v48 = vrot.slane %v4640_v25, %v1307_v34 }
 0x72d   : > { %v1816_v36 = vadd.f32 %v1815_v24, %v1742_v30 }
 0x772   : > { %v1652_v14 = vpop.xlane.xlu1 %1651 }
 0x773   : > { %v1653_v15 = vmul.f32 0.03125, %v1652_v14 }
 0x775   : > { %v1654_v16 = vadd.f32 1e-12, %v1653_v15 }
 0x777   : > { %3464 = vrsqrt.f32 %v1654_v16 }
 0x781   : > { %v3465_v18 = vpop.eup %3464 }
 0x782   : > { %v1656_v21 = vmul.f32 %v3465_v18, %v1648_v59  ;;  %v1125_v18 = vld [vmem:[%s4476_s27 + $0x60] sm:$0xff] }
 0x784   : > { %v1660_v22 = vmul.f32 %v1658_v17, %v1656_v21 }
 0x786   : > { %v1664_v23 = vadd.f32 %v1662_v20, %v1660_v22  ;;  %v1126_v20 = vld [vmem:[%s4476_s27 + $0x68] sm:$0xff]  ;;  %v1127_v22 = vld [vmem:[%s4476_s27 + $0x70] sm:$0xff] }
 0x787   : > { %v3275_v21 = vpack.c.bf16 %v1126_v20, %v1125_v18  ;;  %v2216_v18 = vld [vmem:[%s4986_s1] sm:$0x1] }
 0x788   : > { %v1666_v45 = vrot.slane %v1664_v23, 7  ;;  %v1128_v23 = vld [vmem:[%s4476_s27 + $0x78] sm:$0xff] }
 0x78a   : > { %3122 = vmatmul.mubr.msk.f32.vlgmr.msra.gmra.mrb[4].mxu0 %vm1130_vm1, %v1666_v45  ;;  %v3278_v45 = vpack.c.bf16 %v1128_v23, %v1127_v22 }
 0x78b   : > { %3143 = vmatprep.mubr.msk.f32.mxu0 %vm1130_vm1, %v1087_v10  ;;  %3261 = vmatpush3.bf16.msra.mxu0 %v3258_v42 }
 0x78c   : > { %3263 = vmatprep.subr.bf16.mxu0 %v3262_v44 }
 0x78f   : > { %3265 = vmatpush3.bf16.msra.mxu0 %v3262_v44 }
 0x790   : > { %3157 = vmatprep.subr.msk.mxu0 %vm1481_vm3, %v4588_v62 }
 0x792   : > { %3144 = vmatmul.mubr.msk.f32.vlgmr.msra.gmra.mrb[6].mxu0 %vm1130_vm1, %v1088_v13 }
 0x793   : > { %3158 = vmatpush3.msk.msra.mxu0 %vm1481_vm3, %v4588_v62 }
 0x794   : > { %3274 = vmatprep.subr.bf16.mxu0 %v3868_v11 }
 0x85d   : > { %v1735_v31 = vpop.f32.mrb[4].mxu0 }
 0x85e   : > { %v1736_v32 = vadd.f32 %v1735_v31, %v4640_v25  ;;  %v3123_v35 = vpop.f32.mrb[5].mxu0 }
 0x860   : > { %v1906_v37 = vrot.slane %v1736_v32, %v4529_v27 }
 0x862   : > { %v1908_v38 = vmul.f32 %v1906_v37, %v1821_v33  ;;  %v1907_v39 = vmul.f32 %v1906_v37, %v1816_v36 }
 0x864   : > { %3154 = vmatprep.mubr.msk.f32.mxu1 %vm1130_vm1, %v1907_v39 }
 0x865   : > { %3155 = vmatmul.mubr.msk.f32.vlgmr.msra.gmra.mrb[10].mxu1 %vm1130_vm1, %v1908_v38  ;;  %v3145_v16 = vpop.f32.mrb[6].mxu0 }
 0x866   : > { %3181 = vmatprep.mubr.msk.f32.mxu1 %vm3869_vm2, %v3870_v19  ;;  %v1894_v17 = vpop.f32.mrb[7].mxu0  ;;  %v1900_v24 = vadd.f32 %v3145_v16, %v1827_v48  ;;  %v2298_v16 = vld [vmem:[%s4486_s7 + $0x30] sm:$0xff] }
 0x867   : > { %v1895_v30 = vadd.f32 %v1894_v17, %v1827_v48  ;;  %v2299_v17 = vld [vmem:[%s4486_s7 + $0x38] sm:$0xff]  ;;  %v2960_v48 = vld [vmem:[%s4987_s25] ss:$0 sm:$0xff] }
 0x938   : > { %v3156_v27 = vpop.f32.mrb[10].mxu1 }
 0x939   : > { %v1991_v46 = vmul.f32 0.35355338, %v3156_v27  ;;  %v1981_v47 = vpop.f32.mrb[11].mxu1 }
 0x93a   : > { %v1990_v50 = vmul.f32 0.35355338, %v1981_v47 }
 0x93b   : > { %v1994_v51 = vsel %vm1993_vm6, %v1991_v46, -inf }
 0x93c   : > { %v1992_v52 = vsel %vm1458_vm4, %v1990_v50, -inf }
 0x93d   : > { %v1995_v49 = vmax.f32 %v1992_v52, %v1994_v51 }
 0x93f   : > { %v1996_v55 = vrot.slane %v1995_v49, 4 }
 0x941   : > { %v1997_v57 = vmax.f32 %v1995_v49, %v1996_v55  ;;  %v2212_v55 = vld [vmem:[%s4481_s5] sm:$0xff] }
 0x943   : > { %v1998_v58 = vrot.slane %v1997_v57, 2 }
 0x945   : > { %v1999_v54 = vmax.f32 %v1997_v57, %v1998_v58  ;;  %v2213_v57 = vld [vmem:[%s4481_s5 + $0x8] sm:$0xff] }
 0x946   : > { %v3281_v58 = vpack.c.bf16 %v2213_v57, %v2212_v55 }
 0x947   : > { %v2000_v59 = vrot.slane %v1999_v54, 1 }
 0x948   : > { %3282 = vmatpush3.bf16.msra.mxu1 %v3281_v58 }
 0x949   : > { %v2001_v60 = vmax.f32 %v1999_v54, %v2000_v59  ;;  %3283 = vmatprep.subr.bf16.mxu1 %v3868_v11  ;;  %v2215_v54 = vld [vmem:[%s4481_s5 + $0x18] sm:$0xff] }
 0x94b   : > { %v2002_v61 = vsub.f32 %v1990_v50, %v2001_v60  ;;  %v2003_v62 = vsub.f32 %v1991_v46, %v2001_v60  ;;  %v2292_v60 = vld [vmem:[%s4486_s7] sm:$0xff] }
 0x94d   : > { %v2004_v63 = vmul.f32 1.442695, %v2002_v61  ;;  %v2006_v1 = vmul.f32 1.442695, %v2003_v62  ;;  %v2293_v61 = vld [vmem:[%s4486_s7 + $0x8] sm:$0xff]  ;;  %v2294_v62 = vld [vmem:[%s4486_s7 + $0x10] sm:$0xff] }
 0x94f   : > { %3466 = vpow2.f32 %v2004_v63  ;;  %v3287_v63 = vpack.c.bf16 %v2293_v61, %v2292_v60 }
 0x950   : > { %3468 = vpow2.f32 %v2006_v1  ;;  %v2295_v1 = vld [vmem:[%s4486_s7 + $0x18] sm:$0xff] }
 0x959   : > { %v3467_v0 = vpop.eup %3466 }
 0x95a   : > { %v3469_v2 = vpop.eup %3468  ;;  %v2008_v3 = vsel %vm1458_vm4, %v3467_v0, 0.0 }
 0x95b   : > { %v2009_v4 = vsel %vm1993_vm6, %v3469_v2, 0.0 }
 0x95c   : > { %v2010_v5 = vadd.f32 %v2009_v4, %v2008_v3  ;;  %v2297_v3 = vld [vmem:[%s4486_s7 + $0x28] sm:$0xff] }
 0x95e   : > { %v2011_v6 = vrot.slane %v2010_v5, 4 }
 0x960   : > { %v2012_v7 = vadd.f32 %v2011_v6, %v2010_v5 }
 0x962   : > { %v2013_v8 = vrot.slane %v2012_v7, 2 }
 0x964   : > { %v2014_v9 = vadd.f32 %v2013_v8, %v2012_v7  ;;  %v2206_v8 = vrot.slane %v4532_v28, 3 }
 0x966   : > { %v2015_v10 = vrot.slane %v2014_v9, 1 }
 0x968   : > { %v2016_v12 = vadd.f32 %v2015_v10, %v2014_v9  ;;  %v2209_v10 = vrot.slane %v4535_v29, 3 }
 0x96a   : > { %3470 = vrcp.f32 %v2016_v12 }
 0x974   : > { %v3471_v13 = vpop.eup %3470 }
 0x975   : > { %v2018_v14 = vmul.f32 %v3471_v13, %v3467_v0  ;;  %v2019_v15 = vmul.f32 %v3471_v13, %v3469_v2  ;;  %v3290_v0 = vpack.c.bf16 %v2295_v1, %v2294_v62  ;;  %v2296_v2 = vld [vmem:[%s4486_s7 + $0x20] sm:$0xff] }
 0x976   : > { %v3293_v4 = vpack.c.bf16 %v2297_v3, %v2296_v2 }
 0x977   : > { %3159 = vmatprep.mubr.msk.f32.mxu0 %vm1458_vm4, %v2018_v14 }
 0x978   : > { %3160 = vmatmul.mubr.msk.f32.vlgmr.msra.gmra.mrb[8].mxu0 %vm1458_vm4, %v2019_v15 }
 0x979   : > { %3170 = vmatprep.mubr.msk.f32.mxu0 %vm3869_vm2, %v3870_v19  ;;  %3276 = vmatpush3.bf16.msra.mxu0 %v3275_v21 }
 0x97a   : > { %3277 = vmatprep.subr.bf16.mxu0 %v3868_v11 }
 0x97d   : > { %3279 = vmatpush3.bf16.msra.mxu0 %v3278_v45 }
 0x97e   : > { %3286 = vmatprep.subr.bf16.mxu0 %v3868_v11 }
 0xa4b   : > { %v3161_v31 = vpop.f32.mrb[8].mxu0 }
 0xa4c   : > { %v2102_v32 = vmul.f32 %v3161_v31, %v1900_v24  ;;  %v2092_v33 = vpop.f32.mrb[9].mxu0  ;;  %v2389_v31 = vld [vmem:[%s4989_s0] sm:$0xff] (!%p2939_p6) }
 0xa4d   : > { %v2101_v35 = vmul.f32 %v2092_v33, %v1895_v30  ;;  %2390 = vst.msk [vmem:[%s4491_s10] sm:$0xff] (!%p2939_p6), %vm1130_vm1, %v2389_v31 }
 0xa4e   : > { %v2105_v36 = vsel %vm2104_vm7, %v2102_v32, 0.0  ;;  %2393 = vst.msk [vmem:[#allocation2 - $0x1] sm:$0xfe] (!%p2939_p6), %vm2392_vm9, %v2389_v31 }
 0xa4f   : > { %v2103_v37 = vsel %vm1130_vm1, %v2101_v35, 0.0 }
 0xa50   : > { %v2106_v38 = vadd.f32 %v2105_v36, %v2103_v37 }
 0xa52   : > { %v2107_v39 = vrot.slane %v2106_v38, 4 }
 0xa54   : > { %v2108_v40 = vadd.f32 %v2107_v39, %v2106_v38 }
 0xa56   : > { %v2109_v53 = vrot.slane %v2108_v40, 2 }
 0xa58   : > { %v2110_v41 = vadd.f32 %v2109_v53, %v2108_v40 }
 0xa5a   : > { %v2111_v42 = vrot.slane %v2110_v41, 1 }
 0xa5c   : > { %v2112_v43 = vadd.f32 %v2111_v42, %v2110_v41 }
 0xa5e   : > { %3171 = vmatmul.mubr.msk.f32.vlgmr.msra.gmra.mrb[10].mxu0 %vm1130_vm1, %v2112_v43 }
 0xa5f   : > { %3200 = vmatprep.mubr.msk.f32.mxu0 %vm3869_vm2, %v3870_v19  ;;  %3288 = vmatpush3.bf16.msra.mxu0 %v3287_v63 }
 0xa60   : > { %3289 = vmatprep.subr.bf16.mxu0 %v3868_v11 }
 0xa63   : > { %3291 = vmatpush3.bf16.msra.mxu0 %v3290_v0 }
 0xa64   : > { %3292 = vmatprep.subr.bf16.mxu0 %v3868_v11 }
 0xa67   : > { %3294 = vmatpush3.bf16.msra.mxu0 %v3293_v4 }
 0xa68   : > { %3295 = vmatprep.subr.bf16.mxu0 %v3868_v11  ;;  %v3296_v11 = vpack.c.bf16 %v2299_v17, %v2298_v16 }
 0xa6b   : > { %3297 = vmatpush3.bf16.msra.mxu0 %v3296_v11 }
 0xb31   : > { %v2185_v34 = vpop.f32.mrb[10].mxu0 }
 0xb32   : > { %v2186_v44 = vadd.f32 %v2185_v34, %v2114_v26  ;;  %v3172_v27 = vpop.f32.mrb[11].mxu0 }
 0xb34   : > { %v2190_v46 = vrot.slane %v2186_v44, 1 }
 0xb36   : > { %v2192_v47 = vadd.f32 %v2190_v46, %v4611_v56  ;;  %v2214_v56 = vld [vmem:[%s4481_s5 + $0x10] sm:$0xff] }
 0xb37   : > { %v3284_v59 = vpack.c.bf16 %v2215_v54, %v2214_v56 }
 0xb38   : > { %v2193_v50 = vsel %vm1643_vm5, %v2192_v47, 0.0 }
 0xb39   : > { %2194 = vadd.xlane.f32.xlu0 %v2193_v50  ;;  %3285 = vmatpush3.bf16.msra.mxu1 %v3284_v59 }
 0xbc6   : > { %v2195_v51 = vpop.xlane.xlu0 %2194 }
 0xbc7   : > { %v2196_v52 = vmul.f32 0.03125, %v2195_v51 }
 0xbc9   : > { %v2197_v19 = vsub.f32 %v2192_v47, %v2196_v52 }
 0xbcb   : > { %v2198_v49 = vmul.f32 %v2197_v19, %v2197_v19 }
 0xbcd   : > { %v2199_v25 = vsel %vm1643_vm5, %v2198_v49, 0.0 }
 0xbce   : > { %2200 = vadd.xlane.f32.xlu1 %v2199_v25 }
 0xc5b   : > { %v2201_v5 = vpop.xlane.xlu1 %2200 }
 0xc5c   : > { %v2202_v6 = vmul.f32 0.03125, %v2201_v5 }
 0xc5e   : > { %v2203_v7 = vadd.f32 1e-12, %v2202_v6 }
 0xc60   : > { %3472 = vrsqrt.f32 %v2203_v7 }
 0xc6a   : > { %v3473_v9 = vpop.eup %3472 }
 0xc6b   : > { %v2205_v12 = vmul.f32 %v3473_v9, %v2197_v19 }
 0xc6d   : > { %v2208_v13 = vmul.f32 %v2206_v8, %v2205_v12 }
 0xc6f   : > { %v2211_v14 = vadd.f32 %v2209_v10, %v2208_v13 }
 0xc71   : > { %v2218_v15 = vrot.slane %v2211_v14, 7 }
 0xc73   : > { %3182 = vmatmul.mubr.msk.f32.vlgmr.msra.gmra.mrb[12].mxu1 %vm1130_vm1, %v2218_v15 }
 0xd46   : > { %v2287_v20 = vpop.f32.mrb[12].mxu1 }
 0xd47   : > { %v2288_v21 = vadd.f32 %v2287_v20, %v2216_v18  ;;  %v3183_v22 = vpop.f32.mrb[13].mxu1 }
 0xd49   : > { %v2291_v28 = vmax.f32 %v2288_v21, 0.0 }
 0xd4b   : > { %3201 = vmatmul.mubr.msk.f32.vlgmr.msra.gmra.mrb[12].mxu0 %vm2300_vm8, %v2291_v28 }
 0xe1d   : > { %2388 = sbr.rel (%p2939_p6) target bundleno = 3622 (0xe26), region = 140 }
 0xe1e   : > { %v2370_v29 = vpop.f32.mrb[12].mxu0 }
 0xe1f   : > { %v2375_v23 = vrot.slane %v2370_v29, 1  ;;  %v3202_v45 = vpop.f32.mrb[13].mxu0 }
 0xe21   : > { %v2377_v24 = vadd.f32 %v2375_v23, %v2192_v47 }
 0xe23   : > { %v2385_v30 = vadd.f32 %v2960_v48, %v2377_v24 }
 0xe25   : > { %2391 = vst.msk [vmem:[%s4491_s10 + $0x1] sm:$0x80] %vm1643_vm5, %v2385_v30  ;;  %2394 = vst.msk [vmem:[#allocation2] sm:$0x80] %vm1643_vm5, %v2385_v30 }
 0xe26 PF: > { %s4990_s9 = sld [smem:[#allocation29_spill]] }
 0xe2c   : > { %p2962_p3 = scmp.ne.s32.totalorder %s4990_s9, 1 }
 0xe2d   : > { %s4991_s8 = sld [smem:[#allocation45_spill]] (!%p2962_p3)  ;;  %v2407_v32 = vsel (!%p2962_p3), %vm1643_vm5, %v2385_v30, 0.0  ;;  %2401 = vst.msk [vmem:[%s4496_s3 + $0x1] sm:$0x80] (!%p2962_p3), %vm1643_vm5, %v2385_v30  ;;  %2404 = vst.msk [vmem:[#allocation2] sm:$0x80] (!%p2962_p3), %vm1643_vm5, %v2385_v30 }
 0xe2e   : > { %2398 = sbr.rel (%p2962_p3) target bundleno = 4477 (0x117d), region = 144  ;;  %2408 = vadd.xlane.f32.xlu0 (!%p2962_p3), %v2407_v32  ;;  %vm2402_vm10 = vcmask (!%p2962_p3), 261121   ;;  %s4992_s24 = sld [smem:[#allocation62_spill]] (!%p2962_p3)  ;;  %v3871_v41 = vmov (!%p2962_p3), 0.0|0.0   ;;  %vm3872_vm11 = vmmov (!%p2962_p3), 0   ;;  %v3873_v34 = vmov (!%p2962_p3), 0.0  }
 0xe2f   : > { %3298 = vmatprep.subr.bf16.mxu0 (!%p2962_p3), %v3871_v41  ;;  %3211 = vmatprep.mubr.msk.f32.mxu0 (!%p2962_p3), %vm3872_vm11, %v3873_v34  ;;  %v2964_v19 = vld [vmem:[#allocation12] ss:$0 sm:$0xff] (!%p2962_p3)  ;;  %s4995_s30 = sld [smem:[#allocation63_spill]] (!%p2962_p3)  ;;  %vm2513_vm12 = vcmask (!%p2962_p3), 401408  }
 0xe33   : > { %v2399_v39 = vld [vmem:[%s4991_s8] sm:$0xff] (!%p2962_p3) }
 0xe34   : > { %s4993_s12 = smov (!%p2962_p3), %s4992_s24  ;;  %v2434_v40 = vld [vmem:[%s4992_s24] sm:$0xff] (!%p2962_p3)  ;;  %2400 = vst.msk [vmem:[%s4496_s3] sm:$0xff] (!%p2962_p3), %vm1130_vm1, %v2399_v39  ;;  %s4994_s3 = sld [smem:[#allocation60_spill]] (!%p2962_p3) }
 0xe35   : > { %v2435_v53 = vld [vmem:[%s4993_s12 + $0x8] sm:$0xff]  ;;  %2403 = vst.msk [vmem:[#allocation2 - $0x1] sm:$0xfe] %vm2402_vm10, %v2399_v39  ;;  %v2436_v43 = vld [vmem:[%s4993_s12 + $0x10] sm:$0xff]  ;;  %v2437_v26 = vld [vmem:[%s4993_s12 + $0x18] sm:$0xff] }
 0xe36   : > { %v3299_v42 = vpack.c.bf16 %v2435_v53, %v2434_v40  ;;  %v3302_v44 = vpack.c.bf16 %v2437_v26, %v2436_v43  ;;  %v2438_v57 = vld [vmem:[%s4995_s30] sm:$0x1] }
 0xe38   : > { %3300 = vmatpush3.bf16.msra.mxu0 %v3299_v42 }
 0xe39   : > { %3301 = vmatprep.subr.bf16.mxu0 %v3871_v41 }
 0xe3a   : > { %v2963_v51 = vld [vmem:[%s4994_s3] ss:$0 sm:$0xff] }
 0xe3c   : > { %3303 = vmatpush3.bf16.msra.mxu0 %v3302_v44 }
 0xebb   : > { %v2409_v33 = vpop.xlane.xlu0 %2408 }
 0xebc   : > { %v2410_v35 = vmul.f32 0.03125, %v2409_v33 }
 0xebe   : > { %v2411_v36 = vsub.f32 %v2385_v30, %v2410_v35 }
 0xec0   : > { %v2412_v37 = vmul.f32 %v2411_v36, %v2411_v36 }
 0xec2   : > { %v2413_v38 = vsel %vm1643_vm5, %v2412_v37, 0.0 }
 0xec3   : > { %2414 = vadd.xlane.f32.xlu0 %v2413_v38 }
 0xf50   : > { %v2415_v27 = vpop.xlane.xlu0 %2414 }
 0xf51   : > { %v2416_v46 = vmul.f32 0.03125, %v2415_v27 }
 0xf53   : > { %v2417_v47 = vadd.f32 1e-12, %v2416_v46 }
 0xf55   : > { %3474 = vrsqrt.f32 %v2417_v47 }
 0xf5f   : > { %v3475_v50 = vpop.eup %3474 }
 0xf60   : > { %v2419_v52 = vmul.f32 %v3475_v50, %v2411_v36 }
 0xf62   : > { %v2426_v49 = vmul.f32 %v2963_v51, %v2419_v52 }
 0xf64   : > { %v2433_v25 = vadd.f32 %v2964_v19, %v2426_v49 }
 0xf66   : > { %v2440_v55 = vrot.slane %v2433_v25, 7 }
 0xf68   : > { %3212 = vmatmul.mubr.msk.f32.vlgmr.msra.gmra.mrb[0].mxu0 %vm1130_vm1, %v2440_v55 }
0x103b   : > { %v2509_v58 = vpop.f32.mrb[0].mxu0 }
0x103c   : > { %v2510_v56 = vadd.f32 %v2509_v58, %v2438_v57  ;;  %v3213_v54 = vpop.f32.mrb[1].mxu0 }
0x103e   : > { %v2514_v59 = vsel %vm2513_vm12, %v2510_v56, -inf }
0x103f   : > { %2515 = vmax.xlane.f32.xlu1 %v2514_v59 }
0x10cc   : > { %v2516_v60 = vpop.xlane.xlu1 %2515 }
0x10cd   : > { %v2517_v61 = vsub.f32 %v2510_v56, %v2516_v60 }
0x10cf   : > { %v2518_v62 = vmul.f32 1.442695, %v2517_v61 }
0x10d1   : > { %3476 = vpow2.f32 %v2518_v62 }
0x10db   : > { %v3477_v63 = vpop.eup %3476 }
0x10dc   : > { %v2520_v1 = vsel %vm2513_vm12, %v3477_v63, 0.0 }
0x10dd   : > { %2521 = vadd.xlane.f32.xlu1 %v2520_v1 }
0x116a   : > { %v2522_v0 = vpop.xlane.xlu1 %2521 }
0x116b   : > { %3478 = vlog2.f32 %v2522_v0 }
0x1175   : > { %v3479_v2 = vpop.eup %3478 }
0x1176   : > { %v2524_v3 = vmul.f32 0.6931472, %v3479_v2 }
0x1178   : > { %v2525_v4 = vadd.f32 %v2524_v3, %v2516_v60 }
0x117a   : > { %v2526_v5 = vsub.f32 %v2510_v56, %v2525_v4 }
0x117c   : > { %2527 = vst.msk [vmem:[%s1017_s22] sm:$0x1] %vm2513_vm12, %v2526_v5 }
0x117d PF: > { %s4996_s23 = sld [smem:[#allocation30_spill]]  ;;  %s4997_s4 = sld [smem:[#allocation41_spill]] }
0x117e   : > { %s4998_s26 = sld [smem:[#allocation66_spill]]  ;;  %s2551_s25 = sshll.u32 %s1017_s22, 4  ;;  %s2552_s25 = int_to_ptr.vmem [resolvable:$true] %s2551_s25 }
0x117f   : > { %s2529_s5 = scalar_lea.sflag [#allocation5], %s4431_s20  ;;  %s3716_s0 = scalar_lea.vmem %s2552_s25, 16 }
0x1180   : > { %p3717_p11 = scmp.ne.s32.totalorder %s2552_s25, %s3716_s0  ;;  %s3874_s9 = smov [#allocation16]  }
0x1181   : > { %s3720_s8 = sshll.u32 %s3874_s9, 4  ;;  %s3721_s8 = int_to_ptr.vmem [resolvable:$false] %s3720_s8 }
0x1182   : > { %s3722_s10 = scalar_lea.vmem %s3721_s8, 32  ;;  %p3723_p2 = scmp.lt.s32.totalorder %s2552_s25, %s3721_s8 }
0x1183   : > { %s2966_s14 = sshll.u32 %s4996_s23, 4  ;;  %p4999_p0 = scmp.ne.s32.totalorder %s4997_s4, 0 }
0x1184   : > { %s4754_s1 = scalar_lea.hbm %s4998_s26, %s2966_s14  ;;  %p3724_p4 = scmp.lt.s32.totalorder %s3722_s10, %s3716_s0 }
0x1185   : > { %p3718_p12 = pnand %p3717_p11, %p4999_p0 }
0x1186   : > { %p3725_p1 = por %p3724_p4, %p3723_p2 }
0x1187   : > { %p3719_p10 = pneg %p3718_p12 }
0x1189   : > { %p3726_p5 = pnand %p3725_p1, %p3719_p10 }
0x118b   : > { %3729 = shalt.err (!%p3726_p5)
}
0x118c   : > { %s3730_s20 = scalar_lea.hbm %s4754_s1, 16  ;;  %s3734_s24 = scalar_lea.hbm %s4998_s26, 32 }
0x118d   : > { %p3731_p13 = scmp.ne.s32.totalorder %s4754_s1, %s3730_s20  ;;  %p3735_p9 = scmp.lt.u32.totalorder %s4754_s1, %s4998_s26 }
0x118e   : > { %p3736_p6 = scmp.lt.u32.totalorder %s3734_s24, %s3730_s20  ;;  %p3738_p11 = scmp.lt.u32.totalorder %s3730_s20, %s4754_s1 }
0x118f   : > { %p3732_p8 = pnand %p3731_p13, %p4999_p0 }
0x1190   : > { %p3737_p3 = por %p3736_p6, %p3735_p9 }
0x1191   : > { %p3733_p7 = pneg %p3732_p8 }
0x1192   : > { %p3739_p12 = por %p3738_p11, %p3737_p3 }
0x1194   : > { %p3740_p10 = pnand %p3739_p12, %p3733_p7 }
0x1196   : > { %3743 = shalt.err (!%p3740_p10)
}
0x1197   : > { %3324 = dma.vmem_to_hbm [thread:$0]  (%p4999_p0), %s2552_s25, 16, %s4754_s1, %s2529_s5  }
0x1198 PF: > { %s5000_s28 = sld [smem:[#allocation33_spill]]  ;;  %s5001_s17 = sld [smem:[#allocation24_spill]] }
0x1199   : > { %s5002_s16 = sld [smem:[#allocation39_spill]] }
0x119e   : > { %p3361_p2 = scmp.ge.s32.totalorder %s5000_s28, 2  ;;  %s2569_s11 = sand.u32 1, %s5001_s17  }
0x119f   : > { %p5003_p4 = scmp.ne.s32.totalorder %s5002_s16, 0  ;;  %s2570_s15 = scalar_lea.sflag [#allocation5], %s2569_s11 }
0x11a1   : > { %p3353_p1 = pnand %p3361_p2, %p5003_p4 }
0x11a3   : > { %3813 = dma.done.wait (!%p3353_p1), %s2570_s15, 16  }
0x11a4   : > { %3815 = vsyncadd (!%p3353_p1), %s2570_s15, 4294967280  ;;  %s44_s6 = sadd.s32 1, %s5000_s28   ;;  %s5004_s3 = sld [smem:[#allocation25_spill]] }
0x11a5   : > { %p41_p5 = scmp.ge.s32.totalorder %s44_s6, 6   ;;  %s5005_s28 = sld [smem:[#allocation26_spill]] }
0x11a6   : > { %s5006_s29 = sld [smem:[#allocation43_spill]]  ;;  %s5007_s30 = sld [smem:[#allocation27_spill]] }
0x11a7   : > { %s5008_s4 = sld [smem:[#allocation28_spill]]  ;;  %s5009_s0 = sld [smem:[#allocation35_spill]] }
0x11a8   : > { %s5010_s23 = sld [smem:[#allocation31_spill]]  ;;  %s5011_s1 = sld [smem:[#allocation32_spill]] }
0x11a9   : > { %s5012_s5 = sld [smem:[#allocation34_spill]]  ;;  %s5013_s24 = sld [smem:[#allocation42_spill]] }
0x11aa   :  { %43 = sbr.rel (!%p41_p5) target bundleno = 37 (0x25), region = 271 }
0x11b1   :  { %2590 = vsyncpa [#allocation4], 1 }
0x11b2   :  { %2592 = vsyncpa [#allocation4 + $0x1], 1 }
0x11b3   :  { %2593 = vsyncpa [#allocation7], 1 }
0x11b4   :  { %2595 = vsyncpa [#allocation7 + $0x1], 1 }
0x11b5   :  { %2596 = vsyncpa [#allocation10], 1 }
0x11b6   :  { %2598 = vsyncpa [#allocation10 + $0x1], 1 }
0x11b7   :  { %2599 = vsyncpa [#allocation13], 1 }
0x11b8   :  { %2600 = vsyncpa [#allocation5], 1 }
0x11b9   :  { %2602 = vsyncpa [#allocation5 + $0x1], 1 }

</bundles_post_ra>
